<compile_context>
chip_gen: v7x
topology: tpu7x:2x2x1
jax: 0.10.0
libtpu: 0.0.40
codegen_flags: <defaults>
</compile_context>

<pallas_src>
import functools

import jax
import jax.numpy as jnp
from jax.experimental import pallas as pl
from jax.experimental.pallas import tpu as pltpu


def _layernorm(x, gamma, beta, eps=1e-6):
    # The PyTorch module uses nn.LayerNorm(embed_dim, eps=1e-06) for both norms.
    mean = jnp.mean(x, axis=-1, keepdims=True)
    var = jnp.mean((x - mean) ** 2, axis=-1, keepdims=True)
    return (x - mean) * jax.lax.rsqrt(var + eps) * gamma + beta


def self_attn_block_kernel(
    x_ref,                        # (Bt, S, E)  input block (Bt batch elements)
    g1_ref, b1_ref,               # (1, E)      ln1 gamma/beta (f32)
    wqkv_ref,                     # (E, 3E)     fused QKV weight (transposed, Q scaled)
    bqkv_ref,                     # (1, 3E)     fused QKV bias (f32, Q slice scaled)
    wo_ref, bo_ref,               # (E, E), (1, E)   out_proj (transposed)
    g2_ref, b2_ref,               # (1, E)      ln2 gamma/beta (f32)
    wm_ref, bm_ref,               # (E, M), (1, M)   mlp (transposed)
    out_ref,                      # (Bt, S, E)
    scores_scr,                   # (Bt*H*S, S) f32 VMEM scratch
    xr_scr,                       # (Bt*S, E)   f32 VMEM scratch
    *, num_heads, approx_recip,
):
    bt, S, E = x_ref.shape
    R = bt * S
    d = E // num_heads
    cdt = wqkv_ref.dtype          # matmul operand dtype (bf16 or f32)

    x_in = x_ref[...].reshape(R, E).astype(jnp.float32)

    # ---- LayerNorm 1 + fused QKV projection batched over all Bt*S rows ----
    xn = _layernorm(x_in, g1_ref[0], b1_ref[0]).astype(cdt)
    qkv = jnp.dot(xn, wqkv_ref[...], preferred_element_type=jnp.float32) + bqkv_ref[0]
    q = qkv[:, :E]
    k = qkv[:, E:2 * E]
    v = qkv[:, 2 * E:]

    # ---- QK^T for every (batch, head), stacked on rows of a VMEM scratch ----
    # One shared softmax epilogue for all heads/batches (no per-head exp/sum code).
    for b in range(bt):
        rows = slice(b * S, (b + 1) * S)
        for h in range(num_heads):
            lanes = slice(h * d, (h + 1) * d)
            qh = q[rows, lanes].astype(cdt)
            kh = k[rows, lanes].astype(cdt)
            sc = jnp.dot(qh, kh.T, preferred_element_type=jnp.float32)  # (S, S)
            r0 = (b * num_heads + h) * S
            scores_scr[r0:r0 + S, :] = sc

    s = scores_scr[...]                                    # (Bt*H*S, S) f32
    p = jnp.exp(s - jnp.max(s, axis=-1, keepdims=True))
    denom = jnp.sum(p, axis=-1, keepdims=True)
    p = (p * pl.reciprocal(denom, approx=approx_recip)).astype(cdt)

    # ---- PV + output projection + residual ----
    # Accumulate each head through the matching row-slice of W_o instead of
    # concatenating head outputs along lanes.
    wo = wo_ref[...]
    for b in range(bt):
        rows = slice(b * S, (b + 1) * S)
        acc = jnp.zeros((S, E), jnp.float32)
        for h in range(num_heads):
            lanes = slice(h * d, (h + 1) * d)
            r0 = (b * num_heads + h) * S
            ph = p[r0:r0 + S, :]                           # (S, S) cdt
            vh = v[rows, lanes].astype(cdt)                # (S, d) cdt
            oh = jnp.dot(ph, vh, preferred_element_type=jnp.float32)   # (S, d) f32
            acc = acc + jnp.dot(oh.astype(cdt), wo[lanes, :],
                                preferred_element_type=jnp.float32)    # (S, E) f32
        xr_scr[rows, :] = acc + bo_ref[0] + x_in[rows, :]

    # ---- LayerNorm 2 + MLP linear + residual, batched over all Bt*S rows ----
    xr = xr_scr[...]
    y = _layernorm(xr, g2_ref[0], b2_ref[0]).astype(cdt)
    y = jnp.dot(y, wm_ref[...], preferred_element_type=jnp.float32) + bm_ref[0]
    out_ref[...] = (xr + y).reshape(bt, S, E).astype(out_ref.dtype)


def _pick_batch_tile(B, S, target_rows=256):
    """Largest divisor of B such that Bt*S stays near the MXU pass height."""
    cap = max(1, target_rows // max(S, 1))
    for c in range(min(B, cap), 0, -1):
        if B % c == 0:
            return c
    return 1


def self_attention_block(x, params, num_heads, *, compute_dtype=jnp.bfloat16,
                         block_batch=None, approx_recip=None):
    """x: (B, S, E). params: PyTorch-convention weights. Returns (B, S, E)."""
    B, S, E = x.shape
    M = params["mlp_w"].shape[0]                 # nn.Linear(E, M): weight is (M, E)
    assert M == E, "x + y residual requires mlp_dim == embed_dim"
    assert E % num_heads == 0
    d = E // num_heads
    scale = 1.0 / (d ** 0.5)

    if approx_recip is None:
        approx_recip = (jnp.dtype(compute_dtype) == jnp.dtype(jnp.bfloat16))

    # Split in_proj (3E, E) into q/k/v, transpose so the kernel computes x @ W, fold
    # the attention scale into the Q slice, fuse Q/K/V into one (E, 3E) weight, and
    # cast weight matrices to the MXU operand dtype.
    w_in = params["in_proj_w"].astype(jnp.float32)
    b_in = params["in_proj_b"].astype(jnp.float32)
    wq = w_in[:E].T * scale
    wk = w_in[E:2 * E].T
    wv = w_in[2 * E:].T
    wqkv = jnp.concatenate([wq, wk, wv], axis=1).astype(compute_dtype)   # (E, 3E)
    bqkv = jnp.concatenate([b_in[:E] * scale, b_in[E:2 * E], b_in[2 * E:]])[None, :]
    wo = params["out_proj_w"].T.astype(compute_dtype)
    bo = params["out_proj_b"].astype(jnp.float32)[None, :]
    wm = params["mlp_w"].T.astype(compute_dtype)             # (E, M)
    bm = params["mlp_b"].astype(jnp.float32)[None, :]
    g1 = params["ln1_g"].astype(jnp.float32)[None, :]
    b1 = params["ln1_b"].astype(jnp.float32)[None, :]
    g2 = params["ln2_g"].astype(jnp.float32)[None, :]
    b2 = params["ln2_b"].astype(jnp.float32)[None, :]

    bt = _pick_batch_tile(B, S) if block_batch is None else block_batch
    assert B % bt == 0

    def vec_spec(n):
        return pl.BlockSpec((1, n), lambda i: (0, 0))

    def mat_spec(r, c):
        return pl.BlockSpec((r, c), lambda i: (0, 0))

    kernel = functools.partial(self_attn_block_kernel,
                               num_heads=num_heads, approx_recip=approx_recip)

    # Advisory cost estimate so XLA schedules the wrapper-side weight prep sensibly.
    wbytes = jnp.dtype(compute_dtype).itemsize
    flops = int(B * (2 * S * E * (4 * E + M) + 4 * S * S * E))
    transcendentals = int(B * num_heads * S * S)
    bytes_accessed = int(2 * B * S * E * 4 + (4 * E * E + E * M) * wbytes
                         + (3 * E + 4 * E + E + M) * 4)
    cost = pl.CostEstimate(flops=flops, transcendentals=transcendentals,
                           bytes_accessed=bytes_accessed)

    return pl.pallas_call(
        kernel,
        out_shape=jax.ShapeDtypeStruct((B, S, E), x.dtype),
        grid=(B // bt,),
        in_specs=[
            pl.BlockSpec((bt, S, E), lambda i: (i, 0, 0)),   # x
            vec_spec(E), vec_spec(E),                        # ln1 gamma/beta
            mat_spec(E, 3 * E), vec_spec(3 * E),             # fused wqkv / bqkv
            mat_spec(E, E), vec_spec(E),                     # wo bo
            vec_spec(E), vec_spec(E),                        # ln2 gamma/beta
            mat_spec(E, M), vec_spec(M),                     # wm bm
        ],
        out_specs=pl.BlockSpec((bt, S, E), lambda i: (i, 0, 0)),
        scratch_shapes=[
            pltpu.VMEM((bt * num_heads * S, S), jnp.float32),  # stacked scores
            pltpu.VMEM((bt * S, E), jnp.float32),              # attn residual (x + attn)
        ],
        compiler_params=pltpu.CompilerParams(
            dimension_semantics=("parallel",),      # batch grid axis is independent
            vmem_limit_bytes=32 * 1024 * 1024,
        ),
        cost_estimate=cost,
    )(x, g1, b1, wqkv, bqkv, wo, bo, g2, b2, wm, bm)


def _reference(x, params, num_heads):
    """Pure-JAX f32 reference mirroring the torch module, for verification."""
    B, S, E = x.shape
    d = E // num_heads
    ln = _layernorm
    w_in, b_in = params["in_proj_w"], params["in_proj_b"]
    xn = ln(x, params["ln1_g"], params["ln1_b"])
    q = xn @ w_in[:E].T + b_in[:E]
    k = xn @ w_in[E:2 * E].T + b_in[E:2 * E]
    v = xn @ w_in[2 * E:].T + b_in[2 * E:]
    q = q.reshape(B, S, num_heads, d).transpose(0, 2, 1, 3)
    k = k.reshape(B, S, num_heads, d).transpose(0, 2, 1, 3)
    v = v.reshape(B, S, num_heads, d).transpose(0, 2, 1, 3)
    scores = jnp.einsum("bhqd,bhkd->bhqk", q, k) / jnp.sqrt(d).astype(jnp.float32)
    p = jax.nn.softmax(scores, axis=-1)
    o = jnp.einsum("bhqk,bhkd->bhqd", p, v).transpose(0, 2, 1, 3).reshape(B, S, E)
    o = o @ params["out_proj_w"].T + params["out_proj_b"]
    xr = o + x
    y = ln(xr, params["ln2_g"], params["ln2_b"])
    y = y @ params["mlp_w"].T + params["mlp_b"]
    return xr + y


def make_params(key, embed_dim, mlp_dim):
    E, M = embed_dim, mlp_dim
    ks = jax.random.split(key, 6)
    scale = 0.05
    return {
        "ln1_g": jnp.ones((E,), jnp.float32),
        "ln1_b": jnp.zeros((E,), jnp.float32),
        "in_proj_w": scale * jax.random.normal(ks[0], (3 * E, E), jnp.float32),
        "in_proj_b": scale * jax.random.normal(ks[1], (3 * E,), jnp.float32),
        "out_proj_w": scale * jax.random.normal(ks[2], (E, E), jnp.float32),
        "out_proj_b": scale * jax.random.normal(ks[3], (E,), jnp.float32),
        "ln2_g": jnp.ones((E,), jnp.float32),
        "ln2_b": jnp.zeros((E,), jnp.float32),
        "mlp_w": scale * jax.random.normal(ks[4], (M, E), jnp.float32),
        "mlp_b": scale * jax.random.normal(ks[5], (M,), jnp.float32),
    }


if __name__ == "__main__":
    B, S, E, H = 2, 8, 32, 4
    MLP = E  # must equal E for the x + y residual to broadcast
    key = jax.random.PRNGKey(0)
    kx, kp = jax.random.split(key)
    x = jax.random.normal(kx, (B, S, E), jnp.float32)
    params = make_params(kp, E, MLP)

    ref = _reference(x, params, num_heads=H)

    # Strict f32 path (exact reciprocal): must match the reference tightly.
    out_f32 = jax.block_until_ready(
        self_attention_block(x, params, num_heads=H, compute_dtype=jnp.float32))
    assert out_f32.shape == (B, S, E)
    assert jnp.allclose(out_f32, ref, atol=1e-4, rtol=1e-4), "f32 kernel mismatch"

    # Production bf16-MXU path (f32 accumulation, f32 LN/softmax/residual).
    out_bf16 = jax.block_until_ready(
        self_attention_block(x, params, num_heads=H, compute_dtype=jnp.bfloat16))
    assert out_bf16.shape == (B, S, E)
    assert jnp.allclose(out_bf16, ref, atol=3e-2, rtol=3e-2), "bf16 kernel mismatch"

    print("KERNEL_OK")
</pallas_src>

<mosaic_0001>
module attributes {stable_mosaic.version = 11 : i64} {
  func.func @self_attn_block_kernel(%arg0: i32, %arg1: memref<2x8x32xf32, #tpu.memory_space<vmem>>, %arg2: memref<1x32xf32, #tpu.memory_space<vmem>>, %arg3: memref<1x32xf32, #tpu.memory_space<vmem>>, %arg4: memref<32x96xf32, #tpu.memory_space<vmem>>, %arg5: memref<1x96xf32, #tpu.memory_space<vmem>>, %arg6: memref<32x32xf32, #tpu.memory_space<vmem>>, %arg7: memref<1x32xf32, #tpu.memory_space<vmem>>, %arg8: memref<1x32xf32, #tpu.memory_space<vmem>>, %arg9: memref<1x32xf32, #tpu.memory_space<vmem>>, %arg10: memref<32x32xf32, #tpu.memory_space<vmem>>, %arg11: memref<1x32xf32, #tpu.memory_space<vmem>>, %arg12: memref<2x8x32xf32, #tpu.memory_space<vmem>>, %arg13: memref<64x8xf32, #tpu.memory_space<vmem>>, %arg14: memref<16x32xf32, #tpu.memory_space<vmem>>) attributes {dimension_semantics = [#tpu.dimension_semantics<parallel>], iteration_bounds = array<i64: 1>, scalar_prefetch = 0 : i64, scratch_operands = 2 : i64, tpu.core_type = #tpu.core_type<tc>, window_params = [{transform_indices = @transform_0, window_bounds = array<i64: 2, 8, 32>}, {pipeline_mode = #tpu.pipeline_mode<synchronous>, transform_indices = @transform_1, window_bounds = array<i64: 1, 32>}, {pipeline_mode = #tpu.pipeline_mode<synchronous>, transform_indices = @transform_2, window_bounds = array<i64: 1, 32>}, {pipeline_mode = #tpu.pipeline_mode<synchronous>, transform_indices = @transform_3, window_bounds = array<i64: 32, 96>}, {pipeline_mode = #tpu.pipeline_mode<synchronous>, transform_indices = @transform_4, window_bounds = array<i64: 1, 96>}, {pipeline_mode = #tpu.pipeline_mode<synchronous>, transform_indices = @transform_5, window_bounds = array<i64: 32, 32>}, {pipeline_mode = #tpu.pipeline_mode<synchronous>, transform_indices = @transform_6, window_bounds = array<i64: 1, 32>}, {pipeline_mode = #tpu.pipeline_mode<synchronous>, transform_indices = @transform_7, window_bounds = array<i64: 1, 32>}, {pipeline_mode = #tpu.pipeline_mode<synchronous>, transform_indices = @transform_8, window_bounds = array<i64: 1, 32>}, {pipeline_mode = #tpu.pipeline_mode<synchronous>, transform_indices = @transform_9, window_bounds = array<i64: 32, 32>}, {pipeline_mode = #tpu.pipeline_mode<synchronous>, transform_indices = @transform_10, window_bounds = array<i64: 1, 32>}, {transform_indices = @transform_11, window_bounds = array<i64: 2, 8, 32>}]} {
    %c0 = arith.constant 0 : index
    %c0_0 = arith.constant 0 : index
    %c0_1 = arith.constant 0 : index
    %0 = vector.load %arg1[%c0, %c0_0, %c0_1] : memref<2x8x32xf32, #tpu.memory_space<vmem>>, vector<2x8x32xf32>
    %1 = vector.shape_cast %0 : vector<2x8x32xf32> to vector<16x32xf32>
    %c0_2 = arith.constant 0 : index
    %c0_3 = arith.constant 0 : index
    %2 = vector.load %arg2[%c0_2, %c0_3] : memref<1x32xf32, #tpu.memory_space<vmem>>, vector<1x32xf32>
    %3 = vector.shape_cast %2 : vector<1x32xf32> to vector<32xf32>
    %c0_4 = arith.constant 0 : index
    %c0_5 = arith.constant 0 : index
    %4 = vector.load %arg3[%c0_4, %c0_5] : memref<1x32xf32, #tpu.memory_space<vmem>>, vector<1x32xf32>
    %5 = vector.shape_cast %4 : vector<1x32xf32> to vector<32xf32>
    %cst = arith.constant dense<0.000000e+00> : vector<16xf32>
    %6 = vector.multi_reduction <add>, %1, %cst [1] : vector<16x32xf32> to vector<16xf32>
    %7 = vector.shape_cast %6 : vector<16xf32> to vector<16x1xf32>
    %cst_6 = arith.constant 3.200000e+01 : f32
    %8 = vector.broadcast %cst_6 : f32 to vector<16x1xf32>
    %9 = arith.divf %7, %8 : vector<16x1xf32>
    %10 = vector.broadcast %9 : vector<16x1xf32> to vector<16x32xf32>
    %11 = arith.subf %1, %10 : vector<16x32xf32>
    %12 = arith.mulf %11, %11 : vector<16x32xf32>
    %cst_7 = arith.constant dense<0.000000e+00> : vector<16xf32>
    %13 = vector.multi_reduction <add>, %12, %cst_7 [1] : vector<16x32xf32> to vector<16xf32>
    %14 = vector.shape_cast %13 : vector<16xf32> to vector<16x1xf32>
    %cst_8 = arith.constant 3.200000e+01 : f32
    %15 = vector.broadcast %cst_8 : f32 to vector<16x1xf32>
    %16 = arith.divf %14, %15 : vector<16x1xf32>
    %17 = vector.broadcast %9 : vector<16x1xf32> to vector<16x32xf32>
    %18 = arith.subf %1, %17 : vector<16x32xf32>
    %cst_9 = arith.constant 9.99999997E-7 : f32
    %19 = vector.broadcast %cst_9 : f32 to vector<16x1xf32>
    %20 = arith.addf %16, %19 : vector<16x1xf32>
    %21 = math.rsqrt %20 : vector<16x1xf32>
    %22 = vector.broadcast %21 : vector<16x1xf32> to vector<16x32xf32>
    %23 = arith.mulf %18, %22 : vector<16x32xf32>
    %24 = vector.shape_cast %3 : vector<32xf32> to vector<1x32xf32>
    %25 = vector.broadcast %24 : vector<1x32xf32> to vector<16x32xf32>
    %26 = arith.mulf %23, %25 : vector<16x32xf32>
    %27 = vector.shape_cast %5 : vector<32xf32> to vector<1x32xf32>
    %28 = vector.broadcast %27 : vector<1x32xf32> to vector<16x32xf32>
    %29 = arith.addf %26, %28 : vector<16x32xf32>
    %c0_10 = arith.constant 0 : index
    %c0_11 = arith.constant 0 : index
    %30 = vector.load %arg4[%c0_10, %c0_11] : memref<32x96xf32, #tpu.memory_space<vmem>>, vector<32x96xf32>
    %cst_12 = arith.constant dense<0.000000e+00> : vector<16x96xf32>
    %31 = tpu.matmul %29, %30, %cst_12 {dimension_numbers = #tpu.dot_dimension_numbers<[1], [0], [0], [1], [0, 0, 1, 1], [], []>} : vector<16x32xf32>, vector<32x96xf32>, vector<16x96xf32> -> vector<16x96xf32>
    %c0_13 = arith.constant 0 : index
    %c0_14 = arith.constant 0 : index
    %32 = vector.load %arg5[%c0_13, %c0_14] : memref<1x96xf32, #tpu.memory_space<vmem>>, vector<1x96xf32>
    %33 = vector.shape_cast %32 : vector<1x96xf32> to vector<96xf32>
    %34 = vector.shape_cast %33 : vector<96xf32> to vector<1x96xf32>
    %35 = vector.broadcast %34 : vector<1x96xf32> to vector<16x96xf32>
    %36 = arith.addf %31, %35 : vector<16x96xf32>
    %37 = vector.extract_strided_slice %36 {offsets = [0, 0], sizes = [16, 32], strides = [1, 1]} : vector<16x96xf32> to vector<16x32xf32>
    %38 = vector.extract_strided_slice %36 {offsets = [0, 32], sizes = [16, 32], strides = [1, 1]} : vector<16x96xf32> to vector<16x32xf32>
    %39 = vector.extract_strided_slice %36 {offsets = [0, 64], sizes = [16, 32], strides = [1, 1]} : vector<16x96xf32> to vector<16x32xf32>
    %40 = vector.extract_strided_slice %37 {offsets = [0, 0], sizes = [8, 8], strides = [1, 1]} : vector<16x32xf32> to vector<8x8xf32>
    %41 = vector.extract_strided_slice %38 {offsets = [0, 0], sizes = [8, 8], strides = [1, 1]} : vector<16x32xf32> to vector<8x8xf32>
    %42 = tpu.transpose %41, [1, 0] : vector<8x8xf32> -> vector<8x8xf32>
    %cst_15 = arith.constant dense<0.000000e+00> : vector<8x8xf32>
    %43 = tpu.matmul %40, %42, %cst_15 {dimension_numbers = #tpu.dot_dimension_numbers<[1], [0], [0], [1], [0, 0, 1, 1], [], []>} : vector<8x8xf32>, vector<8x8xf32>, vector<8x8xf32> -> vector<8x8xf32>
    %c0_16 = arith.constant 0 : index
    %c0_17 = arith.constant 0 : index
    %44 = vector.load %arg13[%c0_16, %c0_17] : memref<64x8xf32, #tpu.memory_space<vmem>>, vector<8x8xf32>
    tpu.vector_store %arg13[%c0_16, %c0_17], %43 {strides = array<i32>} : memref<64x8xf32, #tpu.memory_space<vmem>>, vector<8x8xf32>,
    %45 = vector.extract_strided_slice %37 {offsets = [0, 8], sizes = [8, 8], strides = [1, 1]} : vector<16x32xf32> to vector<8x8xf32>
    %46 = vector.extract_strided_slice %38 {offsets = [0, 8], sizes = [8, 8], strides = [1, 1]} : vector<16x32xf32> to vector<8x8xf32>
    %47 = tpu.transpose %46, [1, 0] : vector<8x8xf32> -> vector<8x8xf32>
    %cst_18 = arith.constant dense<0.000000e+00> : vector<8x8xf32>
    %48 = tpu.matmul %45, %47, %cst_18 {dimension_numbers = #tpu.dot_dimension_numbers<[1], [0], [0], [1], [0, 0, 1, 1], [], []>} : vector<8x8xf32>, vector<8x8xf32>, vector<8x8xf32> -> vector<8x8xf32>
    %c8 = arith.constant 8 : index
    %c0_19 = arith.constant 0 : index
    %49 = vector.load %arg13[%c8, %c0_19] : memref<64x8xf32, #tpu.memory_space<vmem>>, vector<8x8xf32>
    tpu.vector_store %arg13[%c8, %c0_19], %48 {strides = array<i32>} : memref<64x8xf32, #tpu.memory_space<vmem>>, vector<8x8xf32>,
    %50 = vector.extract_strided_slice %37 {offsets = [0, 16], sizes = [8, 8], strides = [1, 1]} : vector<16x32xf32> to vector<8x8xf32>
    %51 = vector.extract_strided_slice %38 {offsets = [0, 16], sizes = [8, 8], strides = [1, 1]} : vector<16x32xf32> to vector<8x8xf32>
    %52 = tpu.transpose %51, [1, 0] : vector<8x8xf32> -> vector<8x8xf32>
    %cst_20 = arith.constant dense<0.000000e+00> : vector<8x8xf32>
    %53 = tpu.matmul %50, %52, %cst_20 {dimension_numbers = #tpu.dot_dimension_numbers<[1], [0], [0], [1], [0, 0, 1, 1], [], []>} : vector<8x8xf32>, vector<8x8xf32>, vector<8x8xf32> -> vector<8x8xf32>
    %c16 = arith.constant 16 : index
    %c0_21 = arith.constant 0 : index
    %54 = vector.load %arg13[%c16, %c0_21] : memref<64x8xf32, #tpu.memory_space<vmem>>, vector<8x8xf32>
    tpu.vector_store %arg13[%c16, %c0_21], %53 {strides = array<i32>} : memref<64x8xf32, #tpu.memory_space<vmem>>, vector<8x8xf32>,
    %55 = vector.extract_strided_slice %37 {offsets = [0, 24], sizes = [8, 8], strides = [1, 1]} : vector<16x32xf32> to vector<8x8xf32>
    %56 = vector.extract_strided_slice %38 {offsets = [0, 24], sizes = [8, 8], strides = [1, 1]} : vector<16x32xf32> to vector<8x8xf32>
    %57 = tpu.transpose %56, [1, 0] : vector<8x8xf32> -> vector<8x8xf32>
    %cst_22 = arith.constant dense<0.000000e+00> : vector<8x8xf32>
    %58 = tpu.matmul %55, %57, %cst_22 {dimension_numbers = #tpu.dot_dimension_numbers<[1], [0], [0], [1], [0, 0, 1, 1], [], []>} : vector<8x8xf32>, vector<8x8xf32>, vector<8x8xf32> -> vector<8x8xf32>
    %c24 = arith.constant 24 : index
    %c0_23 = arith.constant 0 : index
    %59 = vector.load %arg13[%c24, %c0_23] : memref<64x8xf32, #tpu.memory_space<vmem>>, vector<8x8xf32>
    tpu.vector_store %arg13[%c24, %c0_23], %58 {strides = array<i32>} : memref<64x8xf32, #tpu.memory_space<vmem>>, vector<8x8xf32>,
    %60 = vector.extract_strided_slice %37 {offsets = [8, 0], sizes = [8, 8], strides = [1, 1]} : vector<16x32xf32> to vector<8x8xf32>
    %61 = vector.extract_strided_slice %38 {offsets = [8, 0], sizes = [8, 8], strides = [1, 1]} : vector<16x32xf32> to vector<8x8xf32>
    %62 = tpu.transpose %61, [1, 0] : vector<8x8xf32> -> vector<8x8xf32>
    %cst_24 = arith.constant dense<0.000000e+00> : vector<8x8xf32>
    %63 = tpu.matmul %60, %62, %cst_24 {dimension_numbers = #tpu.dot_dimension_numbers<[1], [0], [0], [1], [0, 0, 1, 1], [], []>} : vector<8x8xf32>, vector<8x8xf32>, vector<8x8xf32> -> vector<8x8xf32>
    %c32 = arith.constant 32 : index
    %c0_25 = arith.constant 0 : index
    %64 = vector.load %arg13[%c32, %c0_25] : memref<64x8xf32, #tpu.memory_space<vmem>>, vector<8x8xf32>
    tpu.vector_store %arg13[%c32, %c0_25], %63 {strides = array<i32>} : memref<64x8xf32, #tpu.memory_space<vmem>>, vector<8x8xf32>,
    %65 = vector.extract_strided_slice %37 {offsets = [8, 8], sizes = [8, 8], strides = [1, 1]} : vector<16x32xf32> to vector<8x8xf32>
    %66 = vector.extract_strided_slice %38 {offsets = [8, 8], sizes = [8, 8], strides = [1, 1]} : vector<16x32xf32> to vector<8x8xf32>
    %67 = tpu.transpose %66, [1, 0] : vector<8x8xf32> -> vector<8x8xf32>
    %cst_26 = arith.constant dense<0.000000e+00> : vector<8x8xf32>
    %68 = tpu.matmul %65, %67, %cst_26 {dimension_numbers = #tpu.dot_dimension_numbers<[1], [0], [0], [1], [0, 0, 1, 1], [], []>} : vector<8x8xf32>, vector<8x8xf32>, vector<8x8xf32> -> vector<8x8xf32>
    %c40 = arith.constant 40 : index
    %c0_27 = arith.constant 0 : index
    %69 = vector.load %arg13[%c40, %c0_27] : memref<64x8xf32, #tpu.memory_space<vmem>>, vector<8x8xf32>
    tpu.vector_store %arg13[%c40, %c0_27], %68 {strides = array<i32>} : memref<64x8xf32, #tpu.memory_space<vmem>>, vector<8x8xf32>,
    %70 = vector.extract_strided_slice %37 {offsets = [8, 16], sizes = [8, 8], strides = [1, 1]} : vector<16x32xf32> to vector<8x8xf32>
    %71 = vector.extract_strided_slice %38 {offsets = [8, 16], sizes = [8, 8], strides = [1, 1]} : vector<16x32xf32> to vector<8x8xf32>
    %72 = tpu.transpose %71, [1, 0] : vector<8x8xf32> -> vector<8x8xf32>
    %cst_28 = arith.constant dense<0.000000e+00> : vector<8x8xf32>
    %73 = tpu.matmul %70, %72, %cst_28 {dimension_numbers = #tpu.dot_dimension_numbers<[1], [0], [0], [1], [0, 0, 1, 1], [], []>} : vector<8x8xf32>, vector<8x8xf32>, vector<8x8xf32> -> vector<8x8xf32>
    %c48 = arith.constant 48 : index
    %c0_29 = arith.constant 0 : index
    %74 = vector.load %arg13[%c48, %c0_29] : memref<64x8xf32, #tpu.memory_space<vmem>>, vector<8x8xf32>
    tpu.vector_store %arg13[%c48, %c0_29], %73 {strides = array<i32>} : memref<64x8xf32, #tpu.memory_space<vmem>>, vector<8x8xf32>,
    %75 = vector.extract_strided_slice %37 {offsets = [8, 24], sizes = [8, 8], strides = [1, 1]} : vector<16x32xf32> to vector<8x8xf32>
    %76 = vector.extract_strided_slice %38 {offsets = [8, 24], sizes = [8, 8], strides = [1, 1]} : vector<16x32xf32> to vector<8x8xf32>
    %77 = tpu.transpose %76, [1, 0] : vector<8x8xf32> -> vector<8x8xf32>
    %cst_30 = arith.constant dense<0.000000e+00> : vector<8x8xf32>
    %78 = tpu.matmul %75, %77, %cst_30 {dimension_numbers = #tpu.dot_dimension_numbers<[1], [0], [0], [1], [0, 0, 1, 1], [], []>} : vector<8x8xf32>, vector<8x8xf32>, vector<8x8xf32> -> vector<8x8xf32>
    %c56 = arith.constant 56 : index
    %c0_31 = arith.constant 0 : index
    %79 = vector.load %arg13[%c56, %c0_31] : memref<64x8xf32, #tpu.memory_space<vmem>>, vector<8x8xf32>
    tpu.vector_store %arg13[%c56, %c0_31], %78 {strides = array<i32>} : memref<64x8xf32, #tpu.memory_space<vmem>>, vector<8x8xf32>,
    %c0_32 = arith.constant 0 : index
    %c0_33 = arith.constant 0 : index
    %80 = vector.load %arg13[%c0_32, %c0_33] : memref<64x8xf32, #tpu.memory_space<vmem>>, vector<64x8xf32>
    %cst_34 = arith.constant dense<0xFF800000> : vector<64xf32>
    %81 = vector.multi_reduction <maximumf>, %80, %cst_34 [1] : vector<64x8xf32> to vector<64xf32>
    %82 = vector.shape_cast %81 : vector<64xf32> to vector<64x1xf32>
    %83 = vector.broadcast %82 : vector<64x1xf32> to vector<64x8xf32>
    %84 = arith.subf %80, %83 : vector<64x8xf32>
    %85 = math.exp %84 : vector<64x8xf32>
    %cst_35 = arith.constant dense<0.000000e+00> : vector<64xf32>
    %86 = vector.multi_reduction <add>, %85, %cst_35 [1] : vector<64x8xf32> to vector<64xf32>
    %87 = vector.shape_cast %86 : vector<64xf32> to vector<64x1xf32>
    %88 = tpu.reciprocal %87 : vector<64x1xf32> -> vector<64x1xf32>
    %89 = vector.broadcast %88 : vector<64x1xf32> to vector<64x8xf32>
    %90 = arith.mulf %85, %89 : vector<64x8xf32>
    %c0_36 = arith.constant 0 : index
    %c0_37 = arith.constant 0 : index
    %91 = vector.load %arg6[%c0_36, %c0_37] : memref<32x32xf32, #tpu.memory_space<vmem>>, vector<32x32xf32>
    %cst_38 = arith.constant 0.000000e+00 : f32
    %92 = vector.broadcast %cst_38 : f32 to vector<8x32xf32>
    %93 = vector.extract_strided_slice %90 {offsets = [0, 0], sizes = [8, 8], strides = [1, 1]} : vector<64x8xf32> to vector<8x8xf32>
    %94 = vector.extract_strided_slice %39 {offsets = [0, 0], sizes = [8, 8], strides = [1, 1]} : vector<16x32xf32> to vector<8x8xf32>
    %cst_39 = arith.constant dense<0.000000e+00> : vector<8x8xf32>
    %95 = tpu.matmul %93, %94, %cst_39 {dimension_numbers = #tpu.dot_dimension_numbers<[1], [0], [0], [1], [0, 0, 1, 1], [], []>} : vector<8x8xf32>, vector<8x8xf32>, vector<8x8xf32> -> vector<8x8xf32>
    %96 = vector.extract_strided_slice %91 {offsets = [0, 0], sizes = [8, 32], strides = [1, 1]} : vector<32x32xf32> to vector<8x32xf32>
    %cst_40 = arith.constant dense<0.000000e+00> : vector<8x32xf32>
    %97 = tpu.matmul %95, %96, %cst_40 {dimension_numbers = #tpu.dot_dimension_numbers<[1], [0], [0], [1], [0, 0, 1, 1], [], []>} : vector<8x8xf32>, vector<8x32xf32>, vector<8x32xf32> -> vector<8x32xf32>
    %98 = arith.addf %92, %97 : vector<8x32xf32>
    %99 = vector.extract_strided_slice %90 {offsets = [8, 0], sizes = [8, 8], strides = [1, 1]} : vector<64x8xf32> to vector<8x8xf32>
    %100 = vector.extract_strided_slice %39 {offsets = [0, 8], sizes = [8, 8], strides = [1, 1]} : vector<16x32xf32> to vector<8x8xf32>
    %cst_41 = arith.constant dense<0.000000e+00> : vector<8x8xf32>
    %101 = tpu.matmul %99, %100, %cst_41 {dimension_numbers = #tpu.dot_dimension_numbers<[1], [0], [0], [1], [0, 0, 1, 1], [], []>} : vector<8x8xf32>, vector<8x8xf32>, vector<8x8xf32> -> vector<8x8xf32>
    %102 = vector.extract_strided_slice %91 {offsets = [8, 0], sizes = [8, 32], strides = [1, 1]} : vector<32x32xf32> to vector<8x32xf32>
    %cst_42 = arith.constant dense<0.000000e+00> : vector<8x32xf32>
    %103 = tpu.matmul %101, %102, %cst_42 {dimension_numbers = #tpu.dot_dimension_numbers<[1], [0], [0], [1], [0, 0, 1, 1], [], []>} : vector<8x8xf32>, vector<8x32xf32>, vector<8x32xf32> -> vector<8x32xf32>
    %104 = arith.addf %98, %103 : vector<8x32xf32>
    %105 = vector.extract_strided_slice %90 {offsets = [16, 0], sizes = [8, 8], strides = [1, 1]} : vector<64x8xf32> to vector<8x8xf32>
    %106 = vector.extract_strided_slice %39 {offsets = [0, 16], sizes = [8, 8], strides = [1, 1]} : vector<16x32xf32> to vector<8x8xf32>
    %cst_43 = arith.constant dense<0.000000e+00> : vector<8x8xf32>
    %107 = tpu.matmul %105, %106, %cst_43 {dimension_numbers = #tpu.dot_dimension_numbers<[1], [0], [0], [1], [0, 0, 1, 1], [], []>} : vector<8x8xf32>, vector<8x8xf32>, vector<8x8xf32> -> vector<8x8xf32>
    %108 = vector.extract_strided_slice %91 {offsets = [16, 0], sizes = [8, 32], strides = [1, 1]} : vector<32x32xf32> to vector<8x32xf32>
    %cst_44 = arith.constant dense<0.000000e+00> : vector<8x32xf32>
    %109 = tpu.matmul %107, %108, %cst_44 {dimension_numbers = #tpu.dot_dimension_numbers<[1], [0], [0], [1], [0, 0, 1, 1], [], []>} : vector<8x8xf32>, vector<8x32xf32>, vector<8x32xf32> -> vector<8x32xf32>
    %110 = arith.addf %104, %109 : vector<8x32xf32>
    %111 = vector.extract_strided_slice %90 {offsets = [24, 0], sizes = [8, 8], strides = [1, 1]} : vector<64x8xf32> to vector<8x8xf32>
    %112 = vector.extract_strided_slice %39 {offsets = [0, 24], sizes = [8, 8], strides = [1, 1]} : vector<16x32xf32> to vector<8x8xf32>
    %cst_45 = arith.constant dense<0.000000e+00> : vector<8x8xf32>
    %113 = tpu.matmul %111, %112, %cst_45 {dimension_numbers = #tpu.dot_dimension_numbers<[1], [0], [0], [1], [0, 0, 1, 1], [], []>} : vector<8x8xf32>, vector<8x8xf32>, vector<8x8xf32> -> vector<8x8xf32>
    %114 = vector.extract_strided_slice %91 {offsets = [24, 0], sizes = [8, 32], strides = [1, 1]} : vector<32x32xf32> to vector<8x32xf32>
    %cst_46 = arith.constant dense<0.000000e+00> : vector<8x32xf32>
    %115 = tpu.matmul %113, %114, %cst_46 {dimension_numbers = #tpu.dot_dimension_numbers<[1], [0], [0], [1], [0, 0, 1, 1], [], []>} : vector<8x8xf32>, vector<8x32xf32>, vector<8x32xf32> -> vector<8x32xf32>
    %116 = arith.addf %110, %115 : vector<8x32xf32>
    %c0_47 = arith.constant 0 : index
    %c0_48 = arith.constant 0 : index
    %117 = vector.load %arg7[%c0_47, %c0_48] : memref<1x32xf32, #tpu.memory_space<vmem>>, vector<1x32xf32>
    %118 = vector.shape_cast %117 : vector<1x32xf32> to vector<32xf32>
    %119 = vector.shape_cast %118 : vector<32xf32> to vector<1x32xf32>
    %120 = vector.broadcast %119 : vector<1x32xf32> to vector<8x32xf32>
    %121 = arith.addf %116, %120 : vector<8x32xf32>
    %122 = vector.extract_strided_slice %1 {offsets = [0, 0], sizes = [8, 32], strides = [1, 1]} : vector<16x32xf32> to vector<8x32xf32>
    %123 = arith.addf %121, %122 : vector<8x32xf32>
    %c0_49 = arith.constant 0 : index
    %c0_50 = arith.constant 0 : index
    %124 = vector.load %arg14[%c0_49, %c0_50] : memref<16x32xf32, #tpu.memory_space<vmem>>, vector<8x32xf32>
    tpu.vector_store %arg14[%c0_49, %c0_50], %123 {strides = array<i32>} : memref<16x32xf32, #tpu.memory_space<vmem>>, vector<8x32xf32>,
    %cst_51 = arith.constant 0.000000e+00 : f32
    %125 = vector.broadcast %cst_51 : f32 to vector<8x32xf32>
    %126 = vector.extract_strided_slice %90 {offsets = [32, 0], sizes = [8, 8], strides = [1, 1]} : vector<64x8xf32> to vector<8x8xf32>
    %127 = vector.extract_strided_slice %39 {offsets = [8, 0], sizes = [8, 8], strides = [1, 1]} : vector<16x32xf32> to vector<8x8xf32>
    %cst_52 = arith.constant dense<0.000000e+00> : vector<8x8xf32>
    %128 = tpu.matmul %126, %127, %cst_52 {dimension_numbers = #tpu.dot_dimension_numbers<[1], [0], [0], [1], [0, 0, 1, 1], [], []>} : vector<8x8xf32>, vector<8x8xf32>, vector<8x8xf32> -> vector<8x8xf32>
    %129 = vector.extract_strided_slice %91 {offsets = [0, 0], sizes = [8, 32], strides = [1, 1]} : vector<32x32xf32> to vector<8x32xf32>
    %cst_53 = arith.constant dense<0.000000e+00> : vector<8x32xf32>
    %130 = tpu.matmul %128, %129, %cst_53 {dimension_numbers = #tpu.dot_dimension_numbers<[1], [0], [0], [1], [0, 0, 1, 1], [], []>} : vector<8x8xf32>, vector<8x32xf32>, vector<8x32xf32> -> vector<8x32xf32>
    %131 = arith.addf %125, %130 : vector<8x32xf32>
    %132 = vector.extract_strided_slice %90 {offsets = [40, 0], sizes = [8, 8], strides = [1, 1]} : vector<64x8xf32> to vector<8x8xf32>
    %133 = vector.extract_strided_slice %39 {offsets = [8, 8], sizes = [8, 8], strides = [1, 1]} : vector<16x32xf32> to vector<8x8xf32>
    %cst_54 = arith.constant dense<0.000000e+00> : vector<8x8xf32>
    %134 = tpu.matmul %132, %133, %cst_54 {dimension_numbers = #tpu.dot_dimension_numbers<[1], [0], [0], [1], [0, 0, 1, 1], [], []>} : vector<8x8xf32>, vector<8x8xf32>, vector<8x8xf32> -> vector<8x8xf32>
    %135 = vector.extract_strided_slice %91 {offsets = [8, 0], sizes = [8, 32], strides = [1, 1]} : vector<32x32xf32> to vector<8x32xf32>
    %cst_55 = arith.constant dense<0.000000e+00> : vector<8x32xf32>
    %136 = tpu.matmul %134, %135, %cst_55 {dimension_numbers = #tpu.dot_dimension_numbers<[1], [0], [0], [1], [0, 0, 1, 1], [], []>} : vector<8x8xf32>, vector<8x32xf32>, vector<8x32xf32> -> vector<8x32xf32>
    %137 = arith.addf %131, %136 : vector<8x32xf32>
    %138 = vector.extract_strided_slice %90 {offsets = [48, 0], sizes = [8, 8], strides = [1, 1]} : vector<64x8xf32> to vector<8x8xf32>
    %139 = vector.extract_strided_slice %39 {offsets = [8, 16], sizes = [8, 8], strides = [1, 1]} : vector<16x32xf32> to vector<8x8xf32>
    %cst_56 = arith.constant dense<0.000000e+00> : vector<8x8xf32>
    %140 = tpu.matmul %138, %139, %cst_56 {dimension_numbers = #tpu.dot_dimension_numbers<[1], [0], [0], [1], [0, 0, 1, 1], [], []>} : vector<8x8xf32>, vector<8x8xf32>, vector<8x8xf32> -> vector<8x8xf32>
    %141 = vector.extract_strided_slice %91 {offsets = [16, 0], sizes = [8, 32], strides = [1, 1]} : vector<32x32xf32> to vector<8x32xf32>
    %cst_57 = arith.constant dense<0.000000e+00> : vector<8x32xf32>
    %142 = tpu.matmul %140, %141, %cst_57 {dimension_numbers = #tpu.dot_dimension_numbers<[1], [0], [0], [1], [0, 0, 1, 1], [], []>} : vector<8x8xf32>, vector<8x32xf32>, vector<8x32xf32> -> vector<8x32xf32>
    %143 = arith.addf %137, %142 : vector<8x32xf32>
    %144 = vector.extract_strided_slice %90 {offsets = [56, 0], sizes = [8, 8], strides = [1, 1]} : vector<64x8xf32> to vector<8x8xf32>
    %145 = vector.extract_strided_slice %39 {offsets = [8, 24], sizes = [8, 8], strides = [1, 1]} : vector<16x32xf32> to vector<8x8xf32>
    %cst_58 = arith.constant dense<0.000000e+00> : vector<8x8xf32>
    %146 = tpu.matmul %144, %145, %cst_58 {dimension_numbers = #tpu.dot_dimension_numbers<[1], [0], [0], [1], [0, 0, 1, 1], [], []>} : vector<8x8xf32>, vector<8x8xf32>, vector<8x8xf32> -> vector<8x8xf32>
    %147 = vector.extract_strided_slice %91 {offsets = [24, 0], sizes = [8, 32], strides = [1, 1]} : vector<32x32xf32> to vector<8x32xf32>
    %cst_59 = arith.constant dense<0.000000e+00> : vector<8x32xf32>
    %148 = tpu.matmul %146, %147, %cst_59 {dimension_numbers = #tpu.dot_dimension_numbers<[1], [0], [0], [1], [0, 0, 1, 1], [], []>} : vector<8x8xf32>, vector<8x32xf32>, vector<8x32xf32> -> vector<8x32xf32>
    %149 = arith.addf %143, %148 : vector<8x32xf32>
    %c0_60 = arith.constant 0 : index
    %c0_61 = arith.constant 0 : index
    %150 = vector.load %arg7[%c0_60, %c0_61] : memref<1x32xf32, #tpu.memory_space<vmem>>, vector<1x32xf32>
    %151 = vector.shape_cast %150 : vector<1x32xf32> to vector<32xf32>
    %152 = vector.shape_cast %151 : vector<32xf32> to vector<1x32xf32>
    %153 = vector.broadcast %152 : vector<1x32xf32> to vector<8x32xf32>
    %154 = arith.addf %149, %153 : vector<8x32xf32>
    %155 = vector.extract_strided_slice %1 {offsets = [8, 0], sizes = [8, 32], strides = [1, 1]} : vector<16x32xf32> to vector<8x32xf32>
    %156 = arith.addf %154, %155 : vector<8x32xf32>
    %c8_62 = arith.constant 8 : index
    %c0_63 = arith.constant 0 : index
    %157 = vector.load %arg14[%c8_62, %c0_63] : memref<16x32xf32, #tpu.memory_space<vmem>>, vector<8x32xf32>
    tpu.vector_store %arg14[%c8_62, %c0_63], %156 {strides = array<i32>} : memref<16x32xf32, #tpu.memory_space<vmem>>, vector<8x32xf32>,
    %c0_64 = arith.constant 0 : index
    %c0_65 = arith.constant 0 : index
    %158 = vector.load %arg14[%c0_64, %c0_65] : memref<16x32xf32, #tpu.memory_space<vmem>>, vector<16x32xf32>
    %c0_66 = arith.constant 0 : index
    %c0_67 = arith.constant 0 : index
    %159 = vector.load %arg8[%c0_66, %c0_67] : memref<1x32xf32, #tpu.memory_space<vmem>>, vector<1x32xf32>
    %160 = vector.shape_cast %159 : vector<1x32xf32> to vector<32xf32>
    %c0_68 = arith.constant 0 : index
    %c0_69 = arith.constant 0 : index
    %161 = vector.load %arg9[%c0_68, %c0_69] : memref<1x32xf32, #tpu.memory_space<vmem>>, vector<1x32xf32>
    %162 = vector.shape_cast %161 : vector<1x32xf32> to vector<32xf32>
    %cst_70 = arith.constant dense<0.000000e+00> : vector<16xf32>
    %163 = vector.multi_reduction <add>, %158, %cst_70 [1] : vector<16x32xf32> to vector<16xf32>
    %164 = vector.shape_cast %163 : vector<16xf32> to vector<16x1xf32>
    %cst_71 = arith.constant 3.200000e+01 : f32
    %165 = vector.broadcast %cst_71 : f32 to vector<16x1xf32>
    %166 = arith.divf %164, %165 : vector<16x1xf32>
    %167 = vector.broadcast %166 : vector<16x1xf32> to vector<16x32xf32>
    %168 = arith.subf %158, %167 : vector<16x32xf32>
    %169 = arith.mulf %168, %168 : vector<16x32xf32>
    %cst_72 = arith.constant dense<0.000000e+00> : vector<16xf32>
    %170 = vector.multi_reduction <add>, %169, %cst_72 [1] : vector<16x32xf32> to vector<16xf32>
    %171 = vector.shape_cast %170 : vector<16xf32> to vector<16x1xf32>
    %cst_73 = arith.constant 3.200000e+01 : f32
    %172 = vector.broadcast %cst_73 : f32 to vector<16x1xf32>
    %173 = arith.divf %171, %172 : vector<16x1xf32>
    %174 = vector.broadcast %166 : vector<16x1xf32> to vector<16x32xf32>
    %175 = arith.subf %158, %174 : vector<16x32xf32>
    %cst_74 = arith.constant 9.99999997E-7 : f32
    %176 = vector.broadcast %cst_74 : f32 to vector<16x1xf32>
    %177 = arith.addf %173, %176 : vector<16x1xf32>
    %178 = math.rsqrt %177 : vector<16x1xf32>
    %179 = vector.broadcast %178 : vector<16x1xf32> to vector<16x32xf32>
    %180 = arith.mulf %175, %179 : vector<16x32xf32>
    %181 = vector.shape_cast %160 : vector<32xf32> to vector<1x32xf32>
    %182 = vector.broadcast %181 : vector<1x32xf32> to vector<16x32xf32>
    %183 = arith.mulf %180, %182 : vector<16x32xf32>
    %184 = vector.shape_cast %162 : vector<32xf32> to vector<1x32xf32>
    %185 = vector.broadcast %184 : vector<1x32xf32> to vector<16x32xf32>
    %186 = arith.addf %183, %185 : vector<16x32xf32>
    %c0_75 = arith.constant 0 : index
    %c0_76 = arith.constant 0 : index
    %187 = vector.load %arg10[%c0_75, %c0_76] : memref<32x32xf32, #tpu.memory_space<vmem>>, vector<32x32xf32>
    %cst_77 = arith.constant dense<0.000000e+00> : vector<16x32xf32>
    %188 = tpu.matmul %186, %187, %cst_77 {dimension_numbers = #tpu.dot_dimension_numbers<[1], [0], [0], [1], [0, 0, 1, 1], [], []>} : vector<16x32xf32>, vector<32x32xf32>, vector<16x32xf32> -> vector<16x32xf32>
    %c0_78 = arith.constant 0 : index
    %c0_79 = arith.constant 0 : index
    %189 = vector.load %arg11[%c0_78, %c0_79] : memref<1x32xf32, #tpu.memory_space<vmem>>, vector<1x32xf32>
    %190 = vector.shape_cast %189 : vector<1x32xf32> to vector<32xf32>
    %191 = vector.shape_cast %190 : vector<32xf32> to vector<1x32xf32>
    %192 = vector.broadcast %191 : vector<1x32xf32> to vector<16x32xf32>
    %193 = arith.addf %188, %192 : vector<16x32xf32>
    %194 = arith.addf %158, %193 : vector<16x32xf32>
    %195 = vector.shape_cast %194 : vector<16x32xf32> to vector<2x8x32xf32>
    %c0_80 = arith.constant 0 : index
    %c0_81 = arith.constant 0 : index
    %c0_82 = arith.constant 0 : index
    %196 = vector.load %arg12[%c0_80, %c0_81, %c0_82] : memref<2x8x32xf32, #tpu.memory_space<vmem>>, vector<2x8x32xf32>
    tpu.vector_store %arg12[%c0_80, %c0_81, %c0_82], %195 {strides = array<i32>} : memref<2x8x32xf32, #tpu.memory_space<vmem>>, vector<2x8x32xf32>,
    return
  }
  func.func @transform_0(%arg0: i32) -> (i32, i32, i32) {
    %c0_i32 = arith.constant 0 : i32
    %c0_i32_0 = arith.constant 0 : i32
    %c0_i32_1 = arith.constant 0 : i32
    return %arg0, %c0_i32, %c0_i32_0 : i32, i32, i32
  }
  func.func @transform_1(%arg0: i32) -> (i32, i32) {
    %c0_i32 = arith.constant 0 : i32
    %c0_i32_0 = arith.constant 0 : i32
    %c0_i32_1 = arith.constant 0 : i32
    return %c0_i32, %c0_i32_0 : i32, i32
  }
  func.func @transform_2(%arg0: i32) -> (i32, i32) {
    %c0_i32 = arith.constant 0 : i32
    %c0_i32_0 = arith.constant 0 : i32
    %c0_i32_1 = arith.constant 0 : i32
    return %c0_i32, %c0_i32_0 : i32, i32
  }
  func.func @transform_3(%arg0: i32) -> (i32, i32) {
    %c0_i32 = arith.constant 0 : i32
    %c0_i32_0 = arith.constant 0 : i32
    %c0_i32_1 = arith.constant 0 : i32
    return %c0_i32, %c0_i32_0 : i32, i32
  }
  func.func @transform_4(%arg0: i32) -> (i32, i32) {
    %c0_i32 = arith.constant 0 : i32
    %c0_i32_0 = arith.constant 0 : i32
    %c0_i32_1 = arith.constant 0 : i32
    return %c0_i32, %c0_i32_0 : i32, i32
  }
  func.func @transform_5(%arg0: i32) -> (i32, i32) {
    %c0_i32 = arith.constant 0 : i32
    %c0_i32_0 = arith.constant 0 : i32
    %c0_i32_1 = arith.constant 0 : i32
    return %c0_i32, %c0_i32_0 : i32, i32
  }
  func.func @transform_6(%arg0: i32) -> (i32, i32) {
    %c0_i32 = arith.constant 0 : i32
    %c0_i32_0 = arith.constant 0 : i32
    %c0_i32_1 = arith.constant 0 : i32
    return %c0_i32, %c0_i32_0 : i32, i32
  }
  func.func @transform_7(%arg0: i32) -> (i32, i32) {
    %c0_i32 = arith.constant 0 : i32
    %c0_i32_0 = arith.constant 0 : i32
    %c0_i32_1 = arith.constant 0 : i32
    return %c0_i32, %c0_i32_0 : i32, i32
  }
  func.func @transform_8(%arg0: i32) -> (i32, i32) {
    %c0_i32 = arith.constant 0 : i32
    %c0_i32_0 = arith.constant 0 : i32
    %c0_i32_1 = arith.constant 0 : i32
    return %c0_i32, %c0_i32_0 : i32, i32
  }
  func.func @transform_9(%arg0: i32) -> (i32, i32) {
    %c0_i32 = arith.constant 0 : i32
    %c0_i32_0 = arith.constant 0 : i32
    %c0_i32_1 = arith.constant 0 : i32
    return %c0_i32, %c0_i32_0 : i32, i32
  }
  func.func @transform_10(%arg0: i32) -> (i32, i32) {
    %c0_i32 = arith.constant 0 : i32
    %c0_i32_0 = arith.constant 0 : i32
    %c0_i32_1 = arith.constant 0 : i32
    return %c0_i32, %c0_i32_0 : i32, i32
  }
  func.func @transform_11(%arg0: i32) -> (i32, i32, i32) {
    %c0_i32 = arith.constant 0 : i32
    %c0_i32_0 = arith.constant 0 : i32
    %c0_i32_1 = arith.constant 0 : i32
    return %arg0, %c0_i32, %c0_i32_0 : i32, i32, i32
  }
}

</mosaic_0001>

<bundles_post_ra>
// kernel: tpu_custom_call.1
= control target key start
LH: loop header
LB: loop body
LE: loop exit
PB: predicated region body
PF: predicated region fallthrough
CT: control target
= control target key end

     0   :  { %16 = vsyncpa [#allocation5], 0  ;;  %s3339_s0 = inlined_call_operand.hbm [shape: f32[2,8,32], index: 0, kind: input, shape index: {}]   ;;  %s3340_s1 = inlined_call_operand.vmem [shape: f32[1,32], index: 1, kind: input, shape index: {}]   ;;  %s3341_s2 = inlined_call_operand.vmem [shape: f32[1,32], index: 2, kind: input, shape index: {}]   ;;  %s3342_s3 = inlined_call_operand.hbm [shape: f32[32,96], index: 3, kind: input, shape index: {}]   ;;  %s3343_s4 = inlined_call_operand.hbm [shape: f32[1,96], index: 4, kind: input, shape index: {}]   ;;  %s3344_s5 = inlined_call_operand.hbm [shape: f32[32,32], index: 5, kind: input, shape index: {}]   ;;  %s3345_s6 = inlined_call_operand.hbm [shape: f32[1,32], index: 6, kind: input, shape index: {}]   ;;  %s3346_s7 = inlined_call_operand.hbm [shape: f32[1,32], index: 7, kind: input, shape index: {}]   ;;  %s3347_s8 = inlined_call_operand.hbm [shape: f32[1,32], index: 8, kind: input, shape index: {}]   ;;  %s3348_s9 = inlined_call_operand.vmem [shape: f32[32,32], index: 9, kind: input, shape index: {}]   ;;  %s3349_s10 = inlined_call_operand.vmem [shape: f32[1,32], index: 10, kind: input, shape index: {}]   ;;  %s3350_s11 = inlined_call_operand.hbm [shape: f32[2,8,32], index: 11, kind: output, shape index: {}]  }
   0x1   :  { %17 = vsyncpa [#allocation8], 0 }
   0x2   :  { %18 = vsyncpa [#allocation11], 0 }
   0x3   :  { %19 = vsyncpa [#allocation14], 0 }
   0x4   :  { %20 = vsyncpa [#allocation6], 0  ;;  %s2886_s17 = smov [#allocation7]   ;;  %s2887_s19 = smov [#allocation10]  }
   0x5   :  { %s42_s18 = sshll.u32 %s2886_s17, 4  ;;  %s64_s20 = sshll.u32 %s2887_s19, 4  ;;  %s43_s18 = int_to_ptr.vmem [resolvable:$true] %s42_s18  ;;  %s2969_s20 = int_to_ptr.vmem [resolvable:$true] %s64_s20 }
   0x6   :  { %s2700_s23 = scalar_lea.hbm %s3342_s3, 512 }
   0x7   :  { %p2701_p0 = scmp.ne.s32.totalorder %s3342_s3, %s2700_s23  ;;  %p2704_p1 = scmp.lt.u32.totalorder %s2700_s23, %s3342_s3 }
   0x9   :  { %p2706_p2 = pnand %p2704_p1, %p2701_p0 }
   0xb   :  { %2709 = shalt.err (!%p2706_p2)
}
   0xc   :  { %s2710_s28 = scalar_lea.vmem %s43_s18, 512  ;;  %p2715_p4 = scmp.lt.s32.totalorder %s43_s18, %s43_s18 }
   0xd   :  { %p2711_p3 = scmp.ne.s32.totalorder %s43_s18, %s2710_s28  ;;  %p2716_p5 = scmp.lt.s32.totalorder %s2710_s28, %s2710_s28 }
   0xf   :  { %p2717_p6 = por %p2716_p5, %p2715_p4 }
  0x11   :  { %p2718_p7 = pnand %p2717_p6, %p2711_p3 }
  0x13   :  { %2721 = shalt.err (!%p2718_p7)
}
  0x14   :  { %s2888_s29 = smov 128   ;;  %s2889_s30 = smov 8  }
  0x15   :  { %48 = dma.hbm_to_vmem [thread:$0]  %s3342_s3, 512, %s43_s18, [#allocation8], %s2888_s29, %s2888_s29, %s2889_s30  }
  0x16   :  { %s2722_s16 = scalar_lea.hbm %s3344_s5, 512 }
  0x17   :  { %p2723_p8 = scmp.ne.s32.totalorder %s3344_s5, %s2722_s16  ;;  %p2726_p9 = scmp.lt.u32.totalorder %s2722_s16, %s3344_s5 }
  0x19   :  { %p2728_p10 = pnand %p2726_p9, %p2723_p8 }
  0x1b   :  { %2731 = shalt.err (!%p2728_p10)
}
  0x1c   :  { %s2732_s23 = scalar_lea.vmem %s2969_s20, 512  ;;  %p2737_p12 = scmp.lt.s32.totalorder %s2969_s20, %s2969_s20 }
  0x1d   :  { %p2733_p11 = scmp.ne.s32.totalorder %s2969_s20, %s2732_s23  ;;  %p2738_p13 = scmp.lt.s32.totalorder %s2732_s23, %s2732_s23 }
  0x1f   :  { %p2739_p0 = por %p2738_p13, %p2737_p12 }
  0x21   :  { %p2740_p1 = pnand %p2739_p0, %p2733_p11 }
  0x23   :  { %2743 = shalt.err (!%p2740_p1)
}
  0x24   :  { %70 = dma.hbm_to_vmem [thread:$0]  %s3344_s5, 512, %s2969_s20, [#allocation11], %s2888_s29, %s2888_s29, %s2889_s30  }
  0x25   :  { %s2890_s24 = smov [#allocation13]   ;;  %s2891_s26 = smov [#allocation4]  }
  0x26   :  { %s87_s25 = sshll.u32 %s2890_s24, 4  ;;  %s26_s27 = sshll.u32 %s2891_s26, 4  ;;  %s88_s25 = int_to_ptr.vmem [resolvable:$true] %s87_s25  ;;  %s3006_s27 = int_to_ptr.vmem [resolvable:$true] %s26_s27 }
  0x27   :  { %s2744_s13 = scalar_lea.hbm %s3346_s7, 16 }
  0x28   :  { %p2745_p2 = scmp.ne.s32.totalorder %s3346_s7, %s2744_s13  ;;  %p2748_p3 = scmp.lt.u32.totalorder %s2744_s13, %s3346_s7 }
  0x2a   :  { %p2750_p4 = pnand %p2748_p3, %p2745_p2 }
  0x2c   :  { %2753 = shalt.err (!%p2750_p4)
}
  0x2d   :  { %s2754_s5 = scalar_lea.vmem %s88_s25, 16  ;;  %s2758_s20 = scalar_lea.vmem %s88_s25, 32 }
  0x2e   :  { %p2755_p5 = scmp.ne.s32.totalorder %s88_s25, %s2754_s5  ;;  %p2759_p6 = scmp.lt.s32.totalorder %s88_s25, %s88_s25 }
  0x2f   :  { %p2760_p7 = scmp.lt.s32.totalorder %s2758_s20, %s2754_s5 }
  0x31   :  { %p2761_p8 = por %p2760_p7, %p2759_p6 }
  0x33   :  { %p2762_p9 = pnand %p2761_p8, %p2755_p5 }
  0x35   :  { %2765 = shalt.err (!%p2762_p9)
}
  0x36   :  { %90 = dma.hbm_to_vmem [thread:$0]  %s3346_s7, 16, %s88_s25, [#allocation14]  }
  0x37   :  { %s2766_s3 = scalar_lea.hbm %s3339_s0, 256 }
  0x38   :  { %p2767_p10 = scmp.ne.s32.totalorder %s3339_s0, %s2766_s3  ;;  %p2770_p11 = scmp.lt.u32.totalorder %s2766_s3, %s3339_s0 }
  0x3a   :  { %p2772_p12 = pnand %p2770_p11, %p2767_p10 }
  0x3c   :  { %2775 = shalt.err (!%p2772_p12)
}
  0x3d   :  { %s2776_s12 = scalar_lea.vmem %s3006_s27, 256  ;;  %p2781_p0 = scmp.lt.s32.totalorder %s3006_s27, %s3006_s27 }
  0x3e   :  { %p2777_p13 = scmp.ne.s32.totalorder %s3006_s27, %s2776_s12  ;;  %p2782_p1 = scmp.lt.s32.totalorder %s2776_s12, %s2776_s12 }
  0x40   :  { %p2783_p2 = por %p2782_p1, %p2781_p0 }
  0x42   :  { %p2784_p3 = pnand %p2783_p2, %p2777_p13 }
  0x44   :  { %2787 = shalt.err (!%p2784_p3)
}
  0x45   :  { %32 = dma.hbm_to_vmem [thread:$0]  %s3339_s0, 256, %s3006_s27, [#allocation5], %s2888_s29, %s2888_s29, %s2889_s30  }
  0x46   :  { %s2892_s13 = smov [#allocation9]   ;;  %s2893_s15 = smov [#allocation12]  }
  0x47   :  { %s55_s14 = sshll.u32 %s2892_s13, 4  ;;  %s77_s16 = sshll.u32 %s2893_s15, 4  ;;  %s56_s14 = int_to_ptr.vmem [resolvable:$true] %s55_s14  ;;  %s78_s16 = int_to_ptr.vmem [resolvable:$true] %s77_s16 }
  0x48   :  { %s2788_s20 = scalar_lea.hbm %s3343_s4, 16 }
  0x49   :  { %p2789_p4 = scmp.ne.s32.totalorder %s3343_s4, %s2788_s20  ;;  %p2792_p5 = scmp.lt.u32.totalorder %s2788_s20, %s3343_s4 }
  0x4b   :  { %p2794_p6 = pnand %p2792_p5, %p2789_p4 }
  0x4d   :  { %2797 = shalt.err (!%p2794_p6)
}
  0x4e   :  { %s2798_s0 = scalar_lea.vmem %s56_s14, 16  ;;  %s2802_s27 = scalar_lea.vmem %s56_s14, 32 }
  0x4f   :  { %p2799_p7 = scmp.ne.s32.totalorder %s56_s14, %s2798_s0  ;;  %p2803_p8 = scmp.lt.s32.totalorder %s56_s14, %s56_s14 }
  0x50   :  { %p2804_p9 = scmp.lt.s32.totalorder %s2802_s27, %s2798_s0 }
  0x52   :  { %p2805_p10 = por %p2804_p9, %p2803_p8 }
  0x54   :  { %p2806_p11 = pnand %p2805_p10, %p2799_p7 }
  0x56   :  { %2809 = shalt.err (!%p2806_p11)
}
  0x57   :  { %58 = dma.hbm_to_vmem [thread:$0]  %s3343_s4, 16, %s56_s14, [#allocation8]  }
  0x58   :  { %s2810_s28 = scalar_lea.hbm %s3345_s6, 16 }
  0x59   :  { %p2811_p12 = scmp.ne.s32.totalorder %s3345_s6, %s2810_s28  ;;  %p2814_p13 = scmp.lt.u32.totalorder %s2810_s28, %s3345_s6 }
  0x5b   :  { %p2816_p0 = pnand %p2814_p13, %p2811_p12 }
  0x5d   :  { %2819 = shalt.err (!%p2816_p0)
}
  0x5e   :  { %s2820_s15 = scalar_lea.vmem %s78_s16, 16  ;;  %s2824_s17 = scalar_lea.vmem %s78_s16, 32 }
  0x5f   :  { %p2821_p1 = scmp.ne.s32.totalorder %s78_s16, %s2820_s15  ;;  %p2825_p2 = scmp.lt.s32.totalorder %s78_s16, %s78_s16 }
  0x60   :  { %p2826_p3 = scmp.lt.s32.totalorder %s2824_s17, %s2820_s15 }
  0x62   :  { %p2827_p4 = por %p2826_p3, %p2825_p2 }
  0x64   :  { %p2828_p5 = pnand %p2827_p4, %p2821_p1 }
  0x66   :  { %2831 = shalt.err (!%p2828_p5)
}
  0x67   :  { %80 = dma.hbm_to_vmem [thread:$0]  %s3345_s6, 16, %s78_s16, [#allocation11]  }
  0x68   :  { %s2894_s5 = smov [#allocation15]   ;;  %s2832_s22 = scalar_lea.hbm %s3347_s8, 16 }
  0x69   :  { %s97_s20 = sshll.u32 %s2894_s5, 4  ;;  %p2833_p6 = scmp.ne.s32.totalorder %s3347_s8, %s2832_s22  ;;  %s98_s20 = int_to_ptr.vmem [resolvable:$true] %s97_s20 }
  0x6a   :  { %p2836_p7 = scmp.lt.u32.totalorder %s2832_s22, %s3347_s8 }
  0x6c   :  { %p2838_p8 = pnand %p2836_p7, %p2833_p6 }
  0x6e   :  { %2841 = shalt.err (!%p2838_p8)
}
  0x6f   :  { %s2842_s18 = scalar_lea.vmem %s98_s20, 16  ;;  %s2846_s6 = scalar_lea.vmem %s98_s20, 32 }
  0x70   :  { %p2843_p9 = scmp.ne.s32.totalorder %s98_s20, %s2842_s18  ;;  %p2847_p10 = scmp.lt.s32.totalorder %s98_s20, %s98_s20 }
  0x71   :  { %p2848_p11 = scmp.lt.s32.totalorder %s2846_s6, %s2842_s18 }
  0x73   :  { %p2849_p12 = por %p2848_p11, %p2847_p10 }
  0x75   :  { %p2850_p13 = pnand %p2849_p12, %p2843_p9 }
  0x77   :  { %2853 = shalt.err (!%p2850_p13)
}
  0x78   :  { %100 = dma.hbm_to_vmem [thread:$0]  %s3347_s8, 16, %s98_s20, [#allocation14]  }
  0x79   :  { %2876 = dma.done.wait [#allocation5], 256  }
  0x7a   :  { %2877 = vsyncadd [#allocation5], 4294967040 }
  0x7b   :  { %2878 = dma.done.wait [#allocation8], 528  }
  0x7c   :  { %2879 = vsyncadd [#allocation8], 4294966768 }
  0x7d   :  { %2880 = dma.done.wait [#allocation11], 528  }
  0x7e   :  { %2881 = vsyncadd [#allocation11], 4294966768 }
  0x7f   :  { %2882 = dma.done.wait [#allocation14], 32  }
  0x80   :  { %2883 = vsyncadd [#allocation14], 4294967264  ;;  %vm130_vm0 = vcmask 261120   ;;  %v3076_v0 = vld [vmem:[#allocation4] sm:$0xff]  ;;  %v3078_v1 = vld [vmem:[#allocation4 + $0x8] sm:$0xff]  ;;  %v2895_v36 = vmov 0.0  }
  0x81   :  { %v131_v2 = vsel %vm130_vm0, %v3076_v0, 0.0  ;;  %v134_v3 = vsel %vm130_vm0, %v3078_v1, 0.0  ;;  %v174_v14 = vld [vmem:[#allocation7] sm:$0xff]  ;;  %v175_v15 = vld [vmem:[#allocation7 + $0x8] sm:$0xff]  ;;  %v176_v16 = vld [vmem:[#allocation7 + $0x10] sm:$0xff]  ;;  %2490 = vmatprep.subr.mxu1 %v2895_v36  ;;  %vm2896_vm1 = vmmov 0  }
  0x82   :  { %132 = vadd.xlane.f32.xlu0 %v131_v2  ;;  %v2621_v17 = vpack.c.bf16 %v175_v15, %v174_v14  ;;  %v177_v18 = vld [vmem:[#allocation7 + $0x18] sm:$0xff]  ;;  %v2375_v27 = vld [vmem:[%s3340_s1] ss:$0 sm:$0xff]  ;;  %2492 = vmatprep.mubr.msk.f32.mxu1 %vm2896_vm1, %v2895_v36  ;;  %s2897_s1 = smov 88   ;;  %s2899_s7 = smov 120   ;;  %vm269_vm2 = vcmask 64512  }
  0x83   :  { %v2625_v19 = vpack.c.bf16 %v177_v18, %v176_v16  ;;  %v2376_v29 = vld [vmem:[%s3341_s2] ss:$0 sm:$0xff]  ;;  %s2898_s2 = smov 96   ;;  %s2900_s25 = smov 112  }
  0x84   :  { %2622 = vmatprep.subr.bf16.mxu0 %v2621_v17  ;;  %v2377_v37 = vld [vmem:[#allocation9] ss:$0 sm:$0xff]  ;;  %s2901_s13 = smov 80   ;;  %s2902_s15 = smov 104  }
  0x85   :  { %2624 = vmatpush3.bf16.msra.mxu0 %v2621_v17  ;;  %s2903_s17 = smov 72   ;;  %s2904_s4 = smov 56  }
  0x86   :  { %135 = vadd.xlane.f32.xlu0 %v134_v3  ;;  %2626 = vmatprep.subr.bf16.mxu0 %v2625_v19  ;;  %s2905_s14 = smov 64   ;;  %s2906_s5 = smov 40  }
  0x87   :  { %s2907_s20 = smov 48  }
  0x89   :  { %2628 = vmatpush3.bf16.msra.mxu0 %v2625_v19 }
  0x8a   :  { %2510 = vmatprep.subr.mxu0 %v2895_v36 }
 0x10f   :  { %v133_v4 = vpop.xlane.xlu0 %132 }
 0x110   :  { %v138_v5 = vmul.f32 0.03125, %v133_v4 }
 0x112   :  { %v140_v6 = vsub.f32 %v3076_v0, %v138_v5 }
 0x113   :  { %v136_v7 = vpop.xlane.xlu0 %135 }
 0x114   :  { %v139_v8 = vmul.f32 0.03125, %v136_v7  ;;  %v142_v9 = vmul.f32 %v140_v6, %v140_v6 }
 0x116   :  { %v141_v10 = vsub.f32 %v3078_v1, %v139_v8  ;;  %v144_v11 = vsel %vm130_vm0, %v142_v9, 0.0 }
 0x117   :  { %145 = vadd.xlane.f32.xlu1 %v144_v11 }
 0x118   :  { %v143_v12 = vmul.f32 %v141_v10, %v141_v10 }
 0x11a   :  { %v147_v13 = vsel %vm130_vm0, %v143_v12, 0.0 }
 0x11b   :  { %148 = vadd.xlane.f32.xlu1 %v147_v13 }
 0x1a4   :  { %v146_v20 = vpop.xlane.xlu1 %145 }
 0x1a5   :  { %v150_v21 = vmul.f32 0.03125, %v146_v20 }
 0x1a7   :  { %v152_v22 = vadd.f32 1e-06, %v150_v21 }
 0x1a8   :  { %v149_v23 = vpop.xlane.xlu1 %148 }
 0x1a9   :  { %2660 = vrsqrt.f32 %v152_v22  ;;  %v151_v24 = vmul.f32 0.03125, %v149_v23 }
 0x1ab   :  { %v153_v25 = vadd.f32 1e-06, %v151_v24 }
 0x1ad   :  { %2662 = vrsqrt.f32 %v153_v25 }
 0x1b3   :  { %v2661_v26 = vpop.eup %2660 }
 0x1b4   :  { %v156_v28 = vmul.f32 %v2661_v26, %v140_v6 }
 0x1b6   :  { %v164_v30 = vmul.f32 %v2375_v27, %v156_v28 }
 0x1b7   :  { %v2663_v31 = vpop.eup %2662 }
 0x1b8   :  { %v157_v32 = vmul.f32 %v2663_v31, %v141_v10  ;;  %v172_v33 = vadd.f32 %v2376_v29, %v164_v30 }
 0x1ba   :  { %v165_v34 = vmul.f32 %v2375_v27, %v157_v32  ;;  %2487 = vmatprep.mubr.msk.f32.mxu0 %vm130_vm0, %v172_v33 }
 0x1bc   :  { %v173_v35 = vadd.f32 %v2376_v29, %v165_v34 }
 0x1be   :  { %2488 = vmatmul.mubr.msk.f32.vlgmr.msra.gmra.mrb[0].mxu0 %vm130_vm0, %v173_v35 }
 0x1bf   :  { %2512 = vmatprep.mubr.msk.f32.mxu0 %vm2896_vm1, %v2895_v36 }
 0x291   :  { %v2489_v38 = vpop.f32.mrb[0].mxu0 }
 0x292   :  { %v257_v39 = vpop.f32.mrb[1].mxu0  ;;  %v3115_v41 = vadd.f32 %v2489_v38, %v2377_v37 }
 0x293   :  { %v3102_v40 = vadd.f32 %v2377_v37, %v257_v39 }
 0x295   :  { %347 = vrot.lane.b32.xlu1 %v3102_v40, %s2897_s1  ;;  %267 = vrot.lane.b32.xlu0 %v3102_v40, %s2898_s2 }
 0x299   :  { %345 = vrot.lane.b32.xlu1 %v3102_v40, %s2899_s7  ;;  %424 = vrot.lane.b32.xlu0 %v3102_v40, %s2900_s25 }
 0x29d   :  { %426 = vrot.lane.b32.xlu1 %v3102_v40, %s2901_s13  ;;  %503 = vrot.lane.b32.xlu0 %v3102_v40, %s2902_s15 }
 0x2a1   :  { %505 = vrot.lane.b32.xlu1 %v3102_v40, %s2903_s17  ;;  %662 = vrot.lane.b32.xlu0 %v3115_v41, %s2897_s1 }
 0x307   :  { %v348_v42 = vpop.permute.xlu1 %347  ;;  %v268_v43 = vpop.permute.xlu0 %267 }
 0x308   :  { %2491 = vmatpush3.xpose.msk.msra.mxu1 %vm269_vm2, %v268_v43 }
 0x309   :  { %2495 = vmatprep.subr.mxu1 %v2895_v36 }
 0x30b   :  { %v346_v44 = vpop.permute.xlu1 %345  ;;  %2493 = vmatmul.mubr.msk.f32.vlgmr.msra.gmra.mrb[0].mxu1 %vm269_vm2, %v3102_v40  ;;  %v425_v45 = vpop.permute.xlu0 %424 }
 0x30c   :  { %2496 = vmatpush3.xpose.msk.msra.mxu1 %vm269_vm2, %v348_v42  ;;  %2497 = vmatprep.mubr.msk.f32.mxu1 %vm2896_vm1, %v2895_v36 }
 0x30d   :  { %2500 = vmatprep.subr.mxu1 %v2895_v36 }
 0x30f   :  { %v427_v46 = vpop.permute.xlu1 %426  ;;  %2498 = vmatmul.mubr.msk.f32.vlgmr.msra.gmra.mrb[2].mxu1 %vm269_vm2, %v346_v44  ;;  %v504_v47 = vpop.permute.xlu0 %503 }
 0x310   :  { %2501 = vmatpush3.xpose.msk.msra.mxu1 %vm269_vm2, %v427_v46  ;;  %2502 = vmatprep.mubr.msk.f32.mxu1 %vm2896_vm1, %v2895_v36 }
 0x311   :  { %2505 = vmatprep.subr.mxu1 %v2895_v36 }
 0x313   :  { %v506_v48 = vpop.permute.xlu1 %505  ;;  %2503 = vmatmul.mubr.msk.f32.vlgmr.msra.gmra.mrb[4].mxu1 %vm269_vm2, %v425_v45  ;;  %v663_v49 = vpop.permute.xlu0 %662 }
 0x314   :  { %2506 = vmatpush3.xpose.msk.msra.mxu1 %vm269_vm2, %v506_v48  ;;  %2507 = vmatprep.mubr.msk.f32.mxu1 %vm2896_vm1, %v2895_v36 }
 0x315   :  { %2515 = vmatprep.subr.mxu1 %v2895_v36 }
 0x317   :  { %2508 = vmatmul.mubr.msk.f32.vlgmr.msra.gmra.mrb[6].mxu1 %vm269_vm2, %v504_v47  ;;  %v3207_v47 = vld [vmem:[#allocation10 + $0x8] sm:$0xff] }
 0x318   :  { %2516 = vmatpush3.xpose.msk.msra.mxu1 %vm269_vm2, %v663_v49  ;;  %2517 = vmatprep.mubr.msk.f32.mxu1 %vm2896_vm1, %v2895_v36 }
 0x319   :  { %2525 = vmatprep.subr.mxu1 %v2895_v36 }
 0x3de   :  { %v340_v50 = vpop.f32.mrb[0].mxu1 }
 0x3df   :  { %344 = vst.msk [vmem:[#allocation2] sm:$0xff] %vm269_vm2, %v340_v50  ;;  %v2494_v51 = vpop.f32.mrb[1].mxu1 }
 0x3e2   :  { %v419_v52 = vpop.f32.mrb[2].mxu1 }
 0x3e3   :  { %423 = vst.msk [vmem:[#allocation2 + $0x8] sm:$0xff] %vm269_vm2, %v419_v52  ;;  %v2499_v53 = vpop.f32.mrb[3].mxu1 }
 0x3e6   :  { %v498_v54 = vpop.f32.mrb[4].mxu1  ;;  %v897_v7 = vld [vmem:[#allocation2] sm:$0xff] }
 0x3e7   :  { %502 = vst.msk [vmem:[#allocation2 + $0x10] sm:$0xff] %vm269_vm2, %v498_v54  ;;  %v2504_v55 = vpop.f32.mrb[5].mxu1  ;;  %v905_v8 = vsel %vm269_vm2, %v897_v7, -inf }
 0x3ea   :  { %v577_v56 = vpop.f32.mrb[6].mxu1  ;;  %v898_v57 = vld [vmem:[#allocation2 + $0x8] sm:$0xff] }
 0x3eb   :  { %581 = vst.msk [vmem:[#allocation2 + $0x18] sm:$0xff] %vm269_vm2, %v577_v56  ;;  %v2509_v58 = vpop.f32.mrb[7].mxu1  ;;  %v908_v59 = vsel %vm269_vm2, %v898_v57, -inf }
 0x3ec   :  { %909 = vmax.xlane.f32.xlu1 %v908_v59 }
 0x3ee   :  { %v899_v60 = vld [vmem:[#allocation2 + $0x10] sm:$0xff] }
 0x3ef   :  { %v911_v61 = vsel %vm269_vm2, %v899_v60, -inf }
 0x3f2   :  { %v900_v9 = vld [vmem:[#allocation2 + $0x18] sm:$0xff] }
 0x3f3   :  { %v914_v10 = vsel %vm269_vm2, %v900_v9, -inf }
 0x3fd   :  { %660 = vrot.lane.b32.xlu1 %v3115_v41, %s2899_s7 }
 0x401   :  { %820 = vrot.lane.b32.xlu1 %v3115_v41, %s2903_s17 }
 0x405   :  { %1073 = vrot.lane.b32.xlu1 %v3102_v40, %s2904_s4 }
 0x429   :  { %912 = vmax.xlane.f32.xlu1 %v911_v61 }
 0x43a   :  { %741 = vrot.lane.b32.xlu1 %v3115_v41, %s2901_s13 }
 0x43e   :  { %739 = vrot.lane.b32.xlu1 %v3115_v41, %s2900_s25 }
 0x442   :  { %997 = vrot.lane.b32.xlu1 %v3102_v40, %s2905_s14 }
 0x479   :  { %v910_v62 = vpop.xlane.xlu1 %909 }
 0x47a   :  { %v930_v63 = vsub.f32 %v898_v57, %v910_v62  ;;  %v993_v57 = vld [vmem:[#allocation10] sm:$0xff] }
 0x47c   :  { %v939_v2 = vmul.f32 1.442695, %v930_v63 }
 0x47d   :  { %v661_v3 = vpop.permute.xlu1 %660 }
 0x47e   :  { %2664 = vpow2.f32 %v939_v2  ;;  %2518 = vmatmul.mubr.msk.f32.vlgmr.msra.gmra.mrb[8].mxu1 %vm269_vm2, %v661_v3 }
 0x47f   :  { %2527 = vmatprep.mubr.msk.f32.mxu1 %vm2896_vm1, %v2895_v36 }
 0x481   :  { %v821_v4 = vpop.permute.xlu1 %820 }
 0x482   :  { %2526 = vmatpush3.xpose.msk.msra.mxu1 %vm269_vm2, %v821_v4 }
 0x483   :  { %2535 = vmatprep.subr.mxu1 %v2895_v36 }
 0x485   :  { %v1074_v13 = vpop.permute.xlu1 %1073 }
 0x488   :  { %v2665_v5 = vpop.eup %2664 }
 0x489   :  { %v956_v6 = vsel %vm269_vm2, %v2665_v5, 0.0 }
 0x48a   :  { %957 = vadd.xlane.f32.xlu0 %v956_v6 }
 0x4a0   :  { %818 = vrot.lane.b32.xlu0 %v3115_v41, %s2902_s15 }
 0x4b6   :  { %v913_v28 = vpop.xlane.xlu1 %912 }
 0x4b7   :  { %v931_v29 = vsub.f32 %v899_v60, %v913_v28 }
 0x4b9   :  { %v941_v30 = vmul.f32 1.442695, %v931_v29 }
 0x4ba   :  { %v742_v35 = vpop.permute.xlu1 %741 }
 0x4be   :  { %v740_v42 = vpop.permute.xlu1 %739 }
 0x4bf   :  { %906 = vmax.xlane.f32.xlu0 %v905_v8 }
 0x4c2   :  { %v998_v44 = vpop.permute.xlu1 %997 }
 0x4c3   :  { %915 = vmax.xlane.f32.xlu0 %v914_v10 }
 0x517   :  { %v958_v11 = vpop.xlane.xlu0 %957 }
 0x518   :  { %2666 = vrcp.f32 %v958_v11 }
 0x51b   :  { %v819_v12 = vpop.permute.xlu0 %818 }
 0x51c   :  { %2528 = vmatmul.mubr.msk.f32.vlgmr.msra.gmra.mrb[10].mxu1 %vm269_vm2, %v819_v12 }
 0x51d   :  { %2536 = vmatpush3.msra.mxu1 %v1074_v13  ;;  %2537 = vmatprep.mubr.msk.f32.mxu1 %vm2896_vm1, %v2895_v36 }
 0x51e   :  { %2545 = vmatprep.subr.mxu1 %v2895_v36 }
 0x522   :  { %v2667_v14 = vpop.eup %2666 }
 0x523   :  { %v986_v15 = vmul.f32 %v2667_v14, %v2665_v5  ;;  %v3230_v5 = vld [vmem:[#allocation10 + $0x10] sm:$0xff] }
 0x525   :  { %2538 = vmatmul.mubr.msk.f32.vlgmr.msra.gmra.mrb[12].mxu1 %vm269_vm2, %v986_v15 }
 0x526   :  { %2547 = vmatprep.mubr.msk.f32.mxu1 %vm2896_vm1, %v2895_v36  ;;  %2546 = vmatpush3.msra.mxu1 %v993_v57 }
 0x527   :  { %2555 = vmatprep.subr.mxu1 %v2895_v36 }
 0x54c   :  { %v907_v16 = vpop.xlane.xlu0 %906 }
 0x54d   :  { %v929_v17 = vsub.f32 %v897_v7, %v907_v16 }
 0x54f   :  { %v937_v18 = vmul.f32 1.442695, %v929_v17  ;;  %v3240_v17 = vld [vmem:[#allocation10 + $0x18] sm:$0xff] }
 0x550   :  { %v916_v19 = vpop.xlane.xlu0 %915 }
 0x551   :  { %2668 = vpow2.f32 %v937_v18  ;;  %v932_v20 = vsub.f32 %v900_v9, %v916_v19  ;;  %v734_v21 = vpop.f32.mrb[8].mxu1 }
 0x552   :  { %738 = vst.msk [vmem:[#allocation2 + $0x28] sm:$0xff] %vm269_vm2, %v734_v21  ;;  %v2519_v22 = vpop.f32.mrb[9].mxu1 }
 0x553   :  { %v943_v23 = vmul.f32 1.442695, %v932_v20 }
 0x555   :  { %2670 = vpow2.f32 %v943_v23 }
 0x556   :  { %2672 = vpow2.f32 %v941_v30 }
 0x559   :  { %v902_v33 = vld [vmem:[#allocation2 + $0x28] sm:$0xff] }
 0x55a   :  { %v920_v34 = vsel %vm269_vm2, %v902_v33, -inf }
 0x55b   :  { %v2669_v24 = vpop.eup %2668 }
 0x55c   :  { %v953_v25 = vsel %vm269_vm2, %v2669_v24, 0.0 }
 0x55d   :  { %954 = vadd.xlane.f32.xlu0 %v953_v25 }
 0x55f   :  { %v3180_v26 = vpop.eup %2670 }
 0x560   :  { %v962_v27 = vsel %vm269_vm2, %v3180_v26, 0.0  ;;  %v2673_v31 = vpop.eup %2672 }
 0x561   :  { %963 = vadd.xlane.f32.xlu1 %v962_v27  ;;  %v959_v32 = vsel %vm269_vm2, %v2673_v31, 0.0 }
 0x572   :  { %1445 = vrot.lane.b32.xlu1 %v3102_v40, %s2906_s5 }
 0x573   :  { %583 = vrot.lane.b32.xlu0 %v3115_v41, %s2898_s2 }
 0x592   :  { %960 = vadd.xlane.f32.xlu0 %v959_v32 }
 0x5a8   :  { %1295 = vrot.lane.b32.xlu0 %v3102_v40, %s2907_s20 }
 0x5c7   :  { %921 = vmax.xlane.f32.xlu0 %v920_v34 }
 0x5dd   :  { %1681 = vrot.lane.b32.xlu0 %v3115_v41, %s2904_s4 }
 0x5ea   :  { %v955_v37 = vpop.xlane.xlu0 %954 }
 0x5eb   :  { %2674 = vrcp.f32 %v955_v37 }
 0x5ee   :  { %v584_v38 = vpop.permute.xlu0 %583  ;;  %v964_v49 = vpop.xlane.xlu1 %963 }
 0x5ef   :  { %2511 = vmatpush3.xpose.msk.msra.mxu0 %vm269_vm2, %v584_v38  ;;  %v892_v39 = vpop.f32.mrb[10].mxu1 }
 0x5f0   :  { %896 = vst.msk [vmem:[#allocation2 + $0x38] sm:$0xff] %vm269_vm2, %v892_v39  ;;  %v2529_v43 = vpop.f32.mrb[11].mxu1  ;;  %2520 = vmatprep.subr.mxu0 %v2895_v36 }
 0x5f2   :  { %2513 = vmatmul.mubr.msk.f32.vlgmr.msra.gmra.mrb[2].mxu0 %vm269_vm2, %v3115_v41  ;;  %v1446_v55 = vpop.permute.xlu1 %1445 }
 0x5f3   :  { %2521 = vmatpush3.xpose.msk.msra.mxu0 %vm269_vm2, %v742_v35  ;;  %2522 = vmatprep.mubr.msk.f32.mxu0 %vm2896_vm1, %v2895_v36 }
 0x5f4   :  { %2530 = vmatprep.subr.mxu0 %v2895_v36 }
 0x5f5   :  { %v2675_v40 = vpop.eup %2674 }
 0x5f6   :  { %2523 = vmatmul.mubr.msk.f32.vlgmr.msra.gmra.mrb[4].mxu0 %vm269_vm2, %v740_v42  ;;  %v985_v45 = vmul.f32 %v2675_v40, %v2669_v24 }
 0x5f7   :  { %2531 = vmatpush3.msra.mxu0 %v998_v44  ;;  %2532 = vmatprep.mubr.msk.f32.mxu0 %vm2896_vm1, %v2895_v36  ;;  %v904_v14 = vld [vmem:[#allocation2 + $0x38] sm:$0xff] }
 0x5f8   :  { %v1145_v46 = vpop.f32.mrb[12].mxu1  ;;  %2540 = vmatprep.subr.mxu0 %v2895_v36  ;;  %v926_v15 = vsel %vm269_vm2, %v904_v14, -inf }
 0x5f9   :  { %v2539_v48 = vpop.f32.mrb[13].mxu1 }
 0x5fa   :  { %2533 = vmatmul.mubr.msk.f32.vlgmr.msra.gmra.mrb[6].mxu0 %vm269_vm2, %v985_v45 }
 0x5fb   :  { %2541 = vmatpush3.msra.mxu0 %v3207_v47  ;;  %2542 = vmatprep.mubr.msk.f32.mxu0 %vm2896_vm1, %v2895_v36 }
 0x5fc   :  { %2550 = vmatprep.subr.mxu0 %v2895_v36 }
 0x5fe   :  { %2543 = vmatmul.mubr.msk.f32.vlgmr.msra.gmra.mrb[8].mxu0 %vm269_vm2, %v1145_v46 }
 0x5ff   :  { %2552 = vmatprep.mubr.msk.f32.mxu0 %vm2896_vm1, %v2895_v36 }
 0x61f   :  { %v961_v50 = vpop.xlane.xlu0 %960 }
 0x620   :  { %2676 = vrcp.f32 %v961_v50  ;;  %v3264_v50 = vld [vmem:[#allocation12] ss:$0 sm:$0xff] }
 0x621   :  { %2678 = vrcp.f32 %v964_v49 }
 0x623   :  { %v1296_v51 = vpop.permute.xlu0 %1295 }
 0x624   :  { %2551 = vmatpush3.msra.mxu0 %v1296_v51 }
 0x625   :  { %2560 = vmatprep.subr.mxu0 %v2895_v36 }
 0x62a   :  { %v2677_v52 = vpop.eup %2676 }
 0x62b   :  { %v987_v53 = vmul.f32 %v2677_v52, %v2673_v31  ;;  %v2679_v54 = vpop.eup %2678 }
 0x62c   :  { %v988_v56 = vmul.f32 %v2679_v54, %v3180_v26 }
 0x62d   :  { %2553 = vmatmul.mubr.msk.f32.vlgmr.msra.gmra.mrb[10].mxu0 %vm269_vm2, %v987_v53 }
 0x62e   :  { %2561 = vmatpush3.msra.mxu0 %v1446_v55  ;;  %2562 = vmatprep.mubr.msk.f32.mxu0 %vm2896_vm1, %v2895_v36 }
 0x62f   :  { %2570 = vmatprep.subr.mxu0 %v2895_v36 }
 0x631   :  { %2563 = vmatmul.mubr.msk.f32.vlgmr.msra.gmra.mrb[12].mxu0 %vm269_vm2, %v988_v56 }
 0x632   :  { %2572 = vmatprep.mubr.msk.f32.mxu0 %vm2896_vm1, %v2895_v36 }
 0x654   :  { %v922_v58 = vpop.xlane.xlu0 %921 }
 0x655   :  { %v934_v59 = vsub.f32 %v902_v33, %v922_v58 }
 0x657   :  { %v947_v60 = vmul.f32 1.442695, %v934_v59 }
 0x658   :  { %v1682_v22 = vpop.permute.xlu0 %1681 }
 0x659   :  { %2680 = vpow2.f32 %v947_v60 }
 0x663   :  { %v2681_v61 = vpop.eup %2680 }
 0x664   :  { %v968_v62 = vsel %vm269_vm2, %v2681_v61, 0.0 }
 0x665   :  { %969 = vadd.xlane.f32.xlu1 %v968_v62 }
 0x6c5   :  { %v655_v63 = vpop.f32.mrb[2].mxu0 }
 0x6c6   :  { %659 = vst.msk [vmem:[#allocation2 + $0x20] sm:$0xff] %vm269_vm2, %v655_v63  ;;  %v2514_v2 = vpop.f32.mrb[3].mxu0 }
 0x6c9   :  { %v813_v3 = vpop.f32.mrb[4].mxu0 }
 0x6ca   :  { %817 = vst.msk [vmem:[#allocation2 + $0x30] sm:$0xff] %vm269_vm2, %v813_v3  ;;  %v2524_v4 = vpop.f32.mrb[5].mxu0 }
 0x6cd   :  { %v1069_v6 = vpop.f32.mrb[6].mxu0  ;;  %v901_v7 = vld [vmem:[#allocation2 + $0x20] sm:$0xff] }
 0x6ce   :  { %v2534_v8 = vpop.f32.mrb[7].mxu0  ;;  %2548 = vmatmul.mubr.msk.f32.vlgmr.msra.gmra.mrb[14].mxu1 %vm269_vm2, %v1069_v6  ;;  %v917_v9 = vsel %vm269_vm2, %v901_v7, -inf }
 0x6cf   :  { %918 = vmax.xlane.f32.xlu1 %v917_v9  ;;  %2556 = vmatpush3.msra.mxu1 %v3230_v5 }
 0x6d0   :  { %2557 = vmatprep.mubr.msk.f32.mxu1 %vm2896_vm1, %v2895_v36  ;;  %2565 = vmatprep.subr.mxu1 %v2895_v36 }
 0x6d1   :  { %v1218_v10 = vpop.f32.mrb[8].mxu0  ;;  %v903_v11 = vld [vmem:[#allocation2 + $0x30] sm:$0xff] }
 0x6d2   :  { %v2544_v12 = vpop.f32.mrb[9].mxu0  ;;  %v923_v13 = vsel %vm269_vm2, %v903_v11, -inf }
 0x6d3   :  { %924 = vmax.xlane.f32.xlu1 %v923_v13 }
 0x6d7   :  { %927 = vmax.xlane.f32.xlu1 %v926_v15 }
 0x6f2   :  { %v970_v16 = vpop.xlane.xlu1 %969 }
 0x6f3   :  { %2682 = vrcp.f32 %v970_v16 }
 0x6fd   :  { %v2683_v20 = vpop.eup %2682 }
 0x6fe   :  { %v990_v24 = vmul.f32 %v2683_v20, %v2681_v61 }
 0x700   :  { %v1367_v18 = vpop.f32.mrb[10].mxu0 }
 0x701   :  { %v2554_v19 = vpop.f32.mrb[11].mxu0  ;;  %2558 = vmatmul.mubr.msk.f32.vlgmr.msra.gmra.mrb[16].mxu1 %vm269_vm2, %v1367_v18 }
 0x702   :  { %2566 = vmatpush3.msra.mxu1 %v3240_v17  ;;  %2567 = vmatprep.mubr.msk.f32.mxu1 %vm2896_vm1, %v2895_v36 }
 0x703   :  { %2575 = vmatprep.subr.mxu1 %v2895_v36 }
 0x704   :  { %v1517_v21 = vpop.f32.mrb[12].mxu0 }
 0x705   :  { %v2564_v23 = vpop.f32.mrb[13].mxu0  ;;  %2568 = vmatmul.mubr.msk.f32.vlgmr.msra.gmra.mrb[18].mxu1 %vm269_vm2, %v1517_v21 }
 0x706   :  { %2576 = vmatpush3.msra.mxu1 %v1682_v22  ;;  %2577 = vmatprep.mubr.msk.f32.mxu1 %vm2896_vm1, %v2895_v36 }
 0x707   :  { %2585 = vmatprep.subr.mxu1 %v2895_v36 }
 0x709   :  { %2578 = vmatmul.mubr.msk.f32.vlgmr.msra.gmra.mrb[20].mxu1 %vm269_vm2, %v990_v24  ;;  %v2414_v24 = vld [vmem:[#allocation13] ss:$0 sm:$0xff] }
 0x70a   :  { %2586 = vmatpush3.msra.mxu1 %v993_v57  ;;  %2587 = vmatprep.mubr.msk.f32.mxu1 %vm2896_vm1, %v2895_v36 }
 0x70b   :  { %2595 = vmatprep.subr.mxu1 %v2895_v36 }
 0x75c   :  { %v919_v25 = vpop.xlane.xlu1 %918 }
 0x75d   :  { %v933_v26 = vsub.f32 %v901_v7, %v919_v25 }
 0x75f   :  { %v945_v27 = vmul.f32 1.442695, %v933_v26  ;;  %v2415_v26 = vld [vmem:[#allocation15] ss:$0 sm:$0xff] }
 0x760   :  { %v925_v28 = vpop.xlane.xlu1 %924 }
 0x761   :  { %2684 = vpow2.f32 %v945_v27  ;;  %v935_v29 = vsub.f32 %v903_v11, %v925_v28 }
 0x763   :  { %v949_v30 = vmul.f32 1.442695, %v935_v29 }
 0x764   :  { %v928_v35 = vpop.xlane.xlu1 %927 }
 0x765   :  { %2686 = vpow2.f32 %v949_v30  ;;  %v936_v37 = vsub.f32 %v904_v14, %v928_v35 }
 0x767   :  { %v951_v38 = vmul.f32 1.442695, %v936_v37 }
 0x769   :  { %2688 = vpow2.f32 %v951_v38 }
 0x76b   :  { %v2685_v31 = vpop.eup %2684 }
 0x76c   :  { %v965_v32 = vsel %vm269_vm2, %v2685_v31, 0.0 }
 0x76d   :  { %966 = vadd.xlane.f32.xlu1 %v965_v32 }
 0x76f   :  { %v2687_v33 = vpop.eup %2686 }
 0x770   :  { %v971_v34 = vsel %vm269_vm2, %v2687_v33, 0.0 }
 0x771   :  { %972 = vadd.xlane.f32.xlu0 %v971_v34 }
 0x773   :  { %v2689_v42 = vpop.eup %2688 }
 0x774   :  { %v974_v44 = vsel %vm269_vm2, %v2689_v42, 0.0 }
 0x77e   :  { %1605 = vrot.lane.b32.xlu1 %v3115_v41, %s2905_s14 }
 0x782   :  { %1903 = vrot.lane.b32.xlu1 %v3115_v41, %s2907_s20 }
 0x7a1   :  { %v1291_v39 = vpop.f32.mrb[14].mxu1 }
 0x7a2   :  { %v1292_v43 = vadd.f32 %v1291_v39, %v1218_v10  ;;  %v2549_v40 = vpop.f32.mrb[15].mxu1 }
 0x7a6   :  { %975 = vadd.xlane.f32.xlu1 %v974_v44 }
 0x7b7   :  { %2053 = vrot.lane.b32.xlu1 %v3115_v41, %s2906_s5 }
 0x7d4   :  { %v1440_v45 = vpop.f32.mrb[16].mxu1 }
 0x7d5   :  { %v1444_v46 = vadd.f32 %v1440_v45, %v1292_v43  ;;  %v2559_v48 = vpop.f32.mrb[17].mxu1 }
 0x7d6   :  { %v2259_v48 = vld [vmem:[%s3348_s9] sm:$0xff] }
 0x7d8   :  { %v1590_v49 = vpop.f32.mrb[18].mxu1 }
 0x7d9   :  { %v1594_v51 = vadd.f32 %v1590_v49, %v1444_v46  ;;  %v2569_v52 = vpop.f32.mrb[19].mxu1 }
 0x7db   :  { %v1602_v53 = vadd.f32 %v3264_v50, %v1594_v51  ;;  %v2262_v51 = vld [vmem:[%s3348_s9 + $0x18] sm:$0xff] }
 0x7dc   :  { %v1753_v54 = vpop.f32.mrb[20].mxu1 }
 0x7dd   :  { %v1603_v55 = vadd.f32 %v1602_v53, %v3076_v0  ;;  %v2579_v56 = vpop.f32.mrb[21].mxu1 }
 0x7df   :  { %1604 = vst.msk [vmem:[#allocation3] sm:$0xff] %vm130_vm0, %v1603_v55 }
 0x7e6   :  { %v3269_v57 = vld [vmem:[#allocation3] sm:$0xff] }
 0x7e7   :  { %v2217_v41 = vsel %vm130_vm0, %v3269_v57, 0.0 }
 0x7e8   :  { %2218 = vadd.xlane.f32.xlu0 %v2217_v41 }
 0x7fa   :  { %v967_v58 = vpop.xlane.xlu1 %966 }
 0x7fb   :  { %2690 = vrcp.f32 %v967_v58 }
 0x7fe   :  { %v1606_v59 = vpop.permute.xlu1 %1605  ;;  %v973_v60 = vpop.xlane.xlu0 %972 }
 0x7ff   :  { %2571 = vmatpush3.msra.mxu0 %v1606_v59  ;;  %2692 = vrcp.f32 %v973_v60  ;;  %v2416_v60 = vld [vmem:[%s3349_s10] ss:$0 sm:$0xff] }
 0x800   :  { %2580 = vmatprep.subr.mxu0 %v2895_v36 }
 0x802   :  { %v1904_v63 = vpop.permute.xlu1 %1903 }
 0x805   :  { %v2691_v61 = vpop.eup %2690 }
 0x806   :  { %v989_v62 = vmul.f32 %v2691_v61, %v2685_v31 }
 0x808   :  { %2573 = vmatmul.mubr.msk.f32.vlgmr.msra.gmra.mrb[14].mxu0 %vm269_vm2, %v989_v62 }
 0x809   :  { %2581 = vmatpush3.msra.mxu0 %v3207_v47  ;;  %2582 = vmatprep.mubr.msk.f32.mxu0 %vm2896_vm1, %v2895_v36  ;;  %v2693_v0 = vpop.eup %2692 }
 0x80a   :  { %2590 = vmatprep.subr.mxu0 %v2895_v36  ;;  %v991_v2 = vmul.f32 %v2693_v0, %v2687_v33 }
 0x80c   :  { %2583 = vmatmul.mubr.msk.f32.vlgmr.msra.gmra.mrb[16].mxu0 %vm269_vm2, %v1753_v54 }
 0x80d   :  { %2591 = vmatpush3.msra.mxu0 %v1904_v63  ;;  %2592 = vmatprep.mubr.msk.f32.mxu0 %vm2896_vm1, %v2895_v36 }
 0x80e   :  { %2600 = vmatprep.subr.mxu0 %v2895_v36 }
 0x810   :  { %2593 = vmatmul.mubr.msk.f32.vlgmr.msra.gmra.mrb[18].mxu0 %vm269_vm2, %v991_v2 }
 0x811   :  { %2602 = vmatprep.mubr.msk.f32.mxu0 %vm2896_vm1, %v2895_v36 }
 0x833   :  { %v976_v47 = vpop.xlane.xlu1 %975 }
 0x834   :  { %2694 = vrcp.f32 %v976_v47 }
 0x837   :  { %v2054_v3 = vpop.permute.xlu1 %2053 }
 0x838   :  { %2601 = vmatpush3.msra.mxu0 %v2054_v3 }
 0x83e   :  { %v2695_v4 = vpop.eup %2694 }
 0x83f   :  { %v992_v6 = vmul.f32 %v2695_v4, %v2689_v42 }
 0x841   :  { %2603 = vmatmul.mubr.msk.f32.vlgmr.msra.gmra.mrb[20].mxu0 %vm269_vm2, %v992_v6 }
 0x875   :  { %v2219_v7 = vpop.xlane.xlu0 %2218 }
 0x876   :  { %v2223_v8 = vmul.f32 0.03125, %v2219_v7 }
 0x878   :  { %v2225_v9 = vsub.f32 %v3269_v57, %v2223_v8 }
 0x87a   :  { %v2227_v10 = vmul.f32 %v2225_v9, %v2225_v9 }
 0x87c   :  { %v2229_v11 = vsel %vm130_vm0, %v2227_v10, 0.0 }
 0x87d   :  { %2230 = vadd.xlane.f32.xlu0 %v2229_v11 }
 0x8db   :  { %v1677_v12 = vpop.f32.mrb[14].mxu0 }
 0x8dc   :  { %v2574_v13 = vpop.f32.mrb[15].mxu0  ;;  %2588 = vmatmul.mubr.msk.f32.vlgmr.msra.gmra.mrb[22].mxu1 %vm269_vm2, %v1677_v12 }
 0x8dd   :  { %2596 = vmatpush3.msra.mxu1 %v3230_v5  ;;  %2597 = vmatprep.mubr.msk.f32.mxu1 %vm2896_vm1, %v2895_v36 }
 0x8de   :  { %2605 = vmatprep.subr.mxu1 %v2895_v36 }
 0x8df   :  { %v1826_v14 = vpop.f32.mrb[16].mxu0 }
 0x8e0   :  { %v2584_v15 = vpop.f32.mrb[17].mxu0 }
 0x8e3   :  { %v1975_v16 = vpop.f32.mrb[18].mxu0 }
 0x8e4   :  { %v2594_v18 = vpop.f32.mrb[19].mxu0  ;;  %2598 = vmatmul.mubr.msk.f32.vlgmr.msra.gmra.mrb[24].mxu1 %vm269_vm2, %v1975_v16 }
 0x8e5   :  { %2606 = vmatpush3.msra.mxu1 %v3240_v17  ;;  %2607 = vmatprep.mubr.msk.f32.mxu1 %vm2896_vm1, %v2895_v36 }
 0x90a   :  { %v2231_v19 = vpop.xlane.xlu0 %2230 }
 0x90b   :  { %v2235_v20 = vmul.f32 0.03125, %v2231_v19 }
 0x90d   :  { %v2237_v21 = vadd.f32 1e-06, %v2235_v20 }
 0x90f   :  { %2696 = vrsqrt.f32 %v2237_v21 }
 0x914   :  { %v2125_v5 = vpop.f32.mrb[20].mxu0 }
 0x915   :  { %v2604_v22 = vpop.f32.mrb[21].mxu0  ;;  %2608 = vmatmul.mubr.msk.f32.vlgmr.msra.gmra.mrb[26].mxu1 %vm269_vm2, %v2125_v5 }
 0x919   :  { %v2697_v23 = vpop.eup %2696 }
 0x91a   :  { %v2241_v25 = vmul.f32 %v2697_v23, %v2225_v9 }
 0x91c   :  { %v2249_v27 = vmul.f32 %v2414_v24, %v2241_v25 }
 0x91e   :  { %v2257_v28 = vadd.f32 %v2415_v26, %v2249_v27 }
 0x920   :  { %2618 = vmatprep.mubr.msk.f32.mxu0 %vm130_vm0, %v2257_v28 }
 0x9af   :  { %v1899_v17 = vpop.f32.mrb[22].mxu1 }
 0x9b0   :  { %v1900_v29 = vadd.f32 %v1899_v17, %v1826_v14  ;;  %v2589_v30 = vpop.f32.mrb[23].mxu1 }
 0x9b7   :  { %v2048_v36 = vpop.f32.mrb[24].mxu1 }
 0x9b8   :  { %v2052_v31 = vadd.f32 %v2048_v36, %v1900_v29  ;;  %v2599_v32 = vpop.f32.mrb[25].mxu1 }
 0x9e8   :  { %v2198_v33 = vpop.f32.mrb[26].mxu1 }
 0x9e9   :  { %v2202_v34 = vadd.f32 %v2198_v33, %v2052_v31  ;;  %v2609_v35 = vpop.f32.mrb[27].mxu1 }
 0x9eb   :  { %v2210_v37 = vadd.f32 %v3264_v50, %v2202_v34  ;;  %v2261_v50 = vld [vmem:[%s3348_s9 + $0x10] sm:$0xff] }
 0x9ec   :  { %v2633_v52 = vpack.c.bf16 %v2262_v51, %v2261_v50 }
 0x9ed   :  { %v2211_v38 = vadd.f32 %v2210_v37, %v3078_v1  ;;  %v2260_v1 = vld [vmem:[%s3348_s9 + $0x8] sm:$0xff]  ;;  %s2908_s9 = smov [#allocation16]  }
 0x9ee   :  { %v2629_v49 = vpack.c.bf16 %v2260_v1, %v2259_v48  ;;  %s2360_s24 = sshll.u32 %s2908_s9, 4  ;;  %s2361_s24 = int_to_ptr.vmem [resolvable:$true] %s2360_s24 }
 0x9ef   :  { %2212 = vst.msk [vmem:[#allocation3 + $0x8] sm:$0xff] %vm130_vm0, %v2211_v38  ;;  %s2854_s8 = scalar_lea.vmem %s2361_s24, 256  ;;  %p2859_p1 = scmp.lt.s32.totalorder %s2361_s24, %s2361_s24 }
 0x9f0   :  { %2630 = vmatprep.subr.bf16.mxu0 %v2629_v49  ;;  %p2855_p0 = scmp.ne.s32.totalorder %s2361_s24, %s2854_s8  ;;  %p2860_p2 = scmp.lt.s32.totalorder %s2854_s8, %s2854_s8 }
 0x9f1   :  { %2632 = vmatpush3.bf16.msra.mxu0 %v2629_v49 }
 0x9f2   :  { %2634 = vmatprep.subr.bf16.mxu0 %v2633_v52  ;;  %p2861_p3 = por %p2860_p2, %p2859_p1 }
 0x9f4   :  { %p2862_p4 = pnand %p2861_p3, %p2855_p0 }
 0x9f5   :  { %2636 = vmatpush3.bf16.msra.mxu0 %v2633_v52 }
 0x9f6   :  { %v2214_v39 = vld [vmem:[#allocation3 + $0x8] sm:$0xff] }
 0x9f7   :  { %v2220_v42 = vsel %vm130_vm0, %v2214_v39, 0.0 }
 0x9f8   :  { %2221 = vadd.xlane.f32.xlu1 %v2220_v42 }
 0xa85   :  { %v2222_v43 = vpop.xlane.xlu1 %2221 }
 0xa86   :  { %v2224_v40 = vmul.f32 0.03125, %v2222_v43 }
 0xa88   :  { %v2226_v44 = vsub.f32 %v2214_v39, %v2224_v40 }
 0xa8a   :  { %v2228_v45 = vmul.f32 %v2226_v44, %v2226_v44 }
 0xa8c   :  { %v2232_v46 = vsel %vm130_vm0, %v2228_v45, 0.0 }
 0xa8d   :  { %2233 = vadd.xlane.f32.xlu0 %v2232_v46 }
 0xb1a   :  { %v2234_v53 = vpop.xlane.xlu0 %2233 }
 0xb1b   :  { %v2236_v54 = vmul.f32 0.03125, %v2234_v53 }
 0xb1d   :  { %v2238_v55 = vadd.f32 1e-06, %v2236_v54 }
 0xb1f   :  { %2698 = vrsqrt.f32 %v2238_v55 }
 0xb29   :  { %v2699_v56 = vpop.eup %2698 }
 0xb2a   :  { %v2242_v41 = vmul.f32 %v2699_v56, %v2226_v44 }
 0xb2c   :  { %v2250_v58 = vmul.f32 %v2414_v24, %v2242_v41 }
 0xb2e   :  { %v2258_v59 = vadd.f32 %v2415_v26, %v2250_v58 }
 0xb30   :  { %2619 = vmatmul.mubr.msk.f32.vlgmr.msra.gmra.mrb[22].mxu0 %vm130_vm0, %v2258_v59 }
 0xc03   :  { %v2620_v61 = vpop.f32.mrb[22].mxu0 }
 0xc04   :  { %v2348_v62 = vadd.f32 %v2620_v61, %v2416_v60  ;;  %v2342_v0 = vpop.f32.mrb[23].mxu0 }
 0xc05   :  { %v2343_v63 = vadd.f32 %v2416_v60, %v2342_v0 }
 0xc06   :  { %v2352_v2 = vadd.f32 %v2348_v62, %v2214_v39 }
 0xc07   :  { %v2351_v47 = vadd.f32 %v2343_v63, %v3269_v57 }
 0xc08   :  { %2354 = vst.msk [vmem:[#allocation16 + $0x8] sm:$0xff] %vm130_vm0, %v2352_v2 }
 0xc09   :  { %2353 = vst.msk [vmem:[#allocation16] sm:$0xff] %vm130_vm0, %v2351_v47 }
 0xc0a   :  { %2865 = shalt.err (!%p2862_p4)
}
 0xc0b   :  { %s2866_s28 = scalar_lea.hbm %s3350_s11, 256 }
 0xc0c   :  { %p2867_p5 = scmp.ne.s32.totalorder %s3350_s11, %s2866_s28  ;;  %p2870_p6 = scmp.lt.u32.totalorder %s2866_s28, %s3350_s11 }
 0xc0e   :  { %p2872_p7 = pnand %p2870_p6, %p2867_p5 }
 0xc10   :  { %2875 = shalt.err (!%p2872_p7)
}
 0xc11   :  { %2366 = dma.vmem_to_hbm [thread:$0]  %s2361_s24, 256, %s3350_s11, [#allocation6], %s2888_s29, %s2888_s29, %s2889_s30  }
 0xc12   :  { %2884 = dma.done.wait [#allocation6], 256  }
 0xc13   :  { %2885 = vsyncadd [#allocation6], 4294967040 }
 0xc14   :  { %2370 = vsyncpa [#allocation5], 1 }
 0xc15   :  { %2371 = vsyncpa [#allocation8], 1 }
 0xc16   :  { %2372 = vsyncpa [#allocation11], 1 }
 0xc17   :  { %2373 = vsyncpa [#allocation14], 1 }
 0xc18   :  { %2374 = vsyncpa [#allocation6], 1 }

</bundles_post_ra>
